<compile_context>
chip_gen: v6e
topology: v6e:2x2x1
jax: 0.10.0
libtpu: 0.0.40
codegen_flags: <defaults>
</compile_context>

<pallas_src>
import functools

import jax
import jax.numpy as jnp
from jax import lax
from jax.experimental import pallas as pl
from jax.experimental.pallas import tpu as pltpu

_LANE = 128      # lane width: hidden / output padded to a multiple of this
_SUBLANE = 8     # sublane width: batch padded to a multiple of this


def _round_up(n, m):
    return ((n + m - 1) // m) * m


def _vmem_limit_bytes():
    """Generation-aware VMEM budget: ~80% of physical capacity
    (~102 MiB on v5e/v6e's 128 MiB, ~51 MiB on v7x's 64 MiB)."""
    cap = 64 * 1024 * 1024
    try:
        info = pltpu.get_tpu_info()
        cap = int(getattr(info, "vmem_capacity_bytes", cap) or cap)
    except Exception:
        pass
    return int(cap * 0.8)


def _invariant_spec(block_shape, index_map):
    """BlockSpec for a grid-invariant operand (constant index_map): single-buffer
    it so it is not pointlessly double-buffered (halves its VMEM footprint)."""
    if hasattr(pl, "Buffered"):
        try:
            return pl.BlockSpec(block_shape, index_map, pipeline_mode=pl.Buffered(1))
        except TypeError:   # older jax without pipeline_mode on BlockSpec
            pass
    return pl.BlockSpec(block_shape, index_map)


def _recurrent_vmem_bytes(tt, b_tile, in_dim, h_pad, o_pad):
    """Rough per-call VMEM working-set estimate for the recurrent kernels."""
    g4 = 4 * h_pad
    total = 0
    total += 2 * tt * b_tile * in_dim * 2          # x block, double-buffered, bf16
    total += 2 * tt * b_tile * h_pad * 2           # seq out block, double-buffered
    total += (in_dim + h_pad) * g4 * 2             # W_ih + W_hh, single-buffered bf16
    total += g4 * 4                                # bias (f32)
    total += h_pad * o_pad * 2 + o_pad * 4         # head weights + bias
    total += tt * b_tile * g4 * 4                  # xw scratch (f32)
    total += 2 * b_tile * h_pad * 4                # h / c scratch (f32)
    total += 2 * b_tile * o_pad * 4                # head out block
    return total


def _choose_batch_tile(B):
    """Pick the MXU M-dimension (batch tile) and the padded batch.

    Large tiles feed the MXU (M up to 128); when the padded batch allows it we
    keep at least 2 batch tiles so v7x's second TensorCore gets a share of the
    'parallel' grid axis."""
    B8 = _round_up(B, _SUBLANE)
    if B8 < 2 * _SUBLANE:
        bt = B8
    else:
        bt = min(128, _round_up(B8 // 2, _SUBLANE))
    B_pad = _round_up(B8, bt)
    return bt, B_pad


# ----------------------------------------------------------------------------
# LSTM cell math.  Gate columns are pre-reordered to [i, f, o, g] so sigmoid is
# applied to one contiguous (b, 3H) slab and tanh to one (b, H) slab.
# ----------------------------------------------------------------------------
def _lstm_cell_step(gates, c, H):
    sig = jax.nn.sigmoid(gates[:, :3 * H])
    g_g = jnp.tanh(gates[:, 3 * H:])
    i_g = sig[:, :H]
    f_g = sig[:, H:2 * H]
    o_g = sig[:, 2 * H:]
    c_new = f_g * c + i_g * g_g
    h_new = o_g * jnp.tanh(c_new)
    return h_new, c_new


# ----------------------------------------------------------------------------
# Kernel 1: LSTM layer that emits the full hidden sequence (layers 0..L-2).
# Input projection for the whole time block is fused in (one large MXU matmul
# into VMEM scratch); the recurrence then reads xw_scr[i] per step.
# ----------------------------------------------------------------------------
def _lstm_seq_kernel(x_ref, wih_ref, whh_ref, b_ref, out_ref,
                     xw_scr, h_scr, c_scr, *, hidden, tt):
    tb = pl.program_id(1)

    @pl.when(tb == 0)
    def _():
        h_scr[...] = jnp.zeros_like(h_scr)
        c_scr[...] = jnp.zeros_like(c_scr)

    # Fused input projection for the whole time block: (tt*b, In) @ (In, 4H).
    # Leading-dim merge is done in f32 (layout-preserving), operands cast to bf16
    # only at the MXU input; accumulation stays f32.
    tt_, btile, in_dim = x_ref.shape
    x2d = (x_ref[...].astype(jnp.float32)
           .reshape(tt_ * btile, in_dim).astype(jnp.bfloat16))
    xw = jnp.dot(x2d, wih_ref[...], preferred_element_type=jnp.float32) + b_ref[...]
    xw_scr[...] = xw.reshape(tt_, btile, 4 * hidden)

    def step(i, carry):
        h, c = carry
        # W_hh is read from its ref each iteration (not hoisted across the loop).
        gates = xw_scr[i] + jnp.dot(h.astype(jnp.bfloat16), whh_ref[...],
                                    preferred_element_type=jnp.float32)
        h, c = _lstm_cell_step(gates, c, hidden)
        out_ref[i] = h.astype(out_ref.dtype)
        return h, c

    # Time-padding steps (if any) only produce outputs that the last layer masks
    # out, so no masking is needed here.
    h, c = lax.fori_loop(0, tt, step, (h_scr[...], c_scr[...]), unroll=True)
    h_scr[...] = h
    c_scr[...] = c


# ----------------------------------------------------------------------------
# Kernel 2: last LSTM layer -- keeps h/c in scratch only, masks time padding,
# and at the final time block fuses the Linear head: out = h_last @ W_out^T + b.
# ----------------------------------------------------------------------------
def _lstm_last_kernel(x_ref, wih_ref, whh_ref, b_ref, wout_ref, bout_ref, out_ref,
                      xw_scr, h_scr, c_scr, *, hidden, tt, t_valid):
    tb = pl.program_id(1)

    @pl.when(tb == 0)
    def _():
        h_scr[...] = jnp.zeros_like(h_scr)
        c_scr[...] = jnp.zeros_like(c_scr)

    tt_, btile, in_dim = x_ref.shape
    x2d = (x_ref[...].astype(jnp.float32)
           .reshape(tt_ * btile, in_dim).astype(jnp.bfloat16))
    xw = jnp.dot(x2d, wih_ref[...], preferred_element_type=jnp.float32) + b_ref[...]
    xw_scr[...] = xw.reshape(tt_, btile, 4 * hidden)

    def step(i, carry):
        h, c = carry
        gates = xw_scr[i] + jnp.dot(h.astype(jnp.bfloat16), whh_ref[...],
                                    preferred_element_type=jnp.float32)
        h_new, c_new = _lstm_cell_step(gates, c, hidden)
        # Mask time-padding steps: carry h/c through unchanged so the head sees
        # the state at the true last timestep.
        valid = (tb * tt + i) < t_valid
        h = jnp.where(valid, h_new, h)
        c = jnp.where(valid, c_new, c)
        return h, c

    h, c = lax.fori_loop(0, tt, step, (h_scr[...], c_scr[...]), unroll=True)
    h_scr[...] = h
    c_scr[...] = c

    # Fused Linear head, written once at the last time block.  The output block
    # index is constant across the 'arbitrary' time axis (accumulator pattern).
    @pl.when(tb == pl.num_programs(1) - 1)
    def _():
        out_ref[...] = (jnp.dot(h_scr[...].astype(jnp.bfloat16), wout_ref[...],
                                preferred_element_type=jnp.float32)
                        + bout_ref[...]).astype(out_ref.dtype)


# ----------------------------------------------------------------------------
# pallas_call wrappers
# ----------------------------------------------------------------------------
def _lstm_layer_seq(x, w_ih_t, w_hh_t, bias, *, hidden_pad, tt, b_tile,
                    out_dtype, vmem_limit):
    T_pad, B_pad, In = x.shape
    H = hidden_pad
    G4 = 4 * H
    grid = (B_pad // b_tile, T_pad // tt)
    kernel = functools.partial(_lstm_seq_kernel, hidden=H, tt=tt)
    return pl.pallas_call(
        kernel,
        out_shape=jax.ShapeDtypeStruct((T_pad, B_pad, H), out_dtype),
        grid_spec=pltpu.PrefetchScalarGridSpec(
            num_scalar_prefetch=0,
            grid=grid,
            in_specs=[
                pl.BlockSpec((tt, b_tile, In), lambda bi, tb: (tb, bi, 0)),
                _invariant_spec((In, G4), lambda bi, tb: (0, 0)),
                _invariant_spec((H, G4), lambda bi, tb: (0, 0)),
                _invariant_spec((1, G4), lambda bi, tb: (0, 0)),
            ],
            out_specs=pl.BlockSpec((tt, b_tile, H), lambda bi, tb: (tb, bi, 0)),
            scratch_shapes=[
                pltpu.VMEM((tt, b_tile, G4), jnp.float32),   # xw (input projection)
                pltpu.VMEM((b_tile, H), jnp.float32),        # h state
                pltpu.VMEM((b_tile, H), jnp.float32),        # c state
            ],
        ),
        compiler_params=pltpu.CompilerParams(
            dimension_semantics=("parallel", "arbitrary"),
            vmem_limit_bytes=vmem_limit,
        ),
    )(x, w_ih_t, w_hh_t, bias)


def _lstm_layer_last(x, w_ih_t, w_hh_t, bias, w_out_t, b_out, *, hidden_pad, tt,
                     b_tile, t_valid, vmem_limit):
    T_pad, B_pad, In = x.shape
    H = hidden_pad
    G4 = 4 * H
    O = w_out_t.shape[1]
    grid = (B_pad // b_tile, T_pad // tt)
    kernel = functools.partial(_lstm_last_kernel, hidden=H, tt=tt, t_valid=t_valid)
    return pl.pallas_call(
        kernel,
        out_shape=jax.ShapeDtypeStruct((B_pad, O), jnp.float32),
        grid_spec=pltpu.PrefetchScalarGridSpec(
            num_scalar_prefetch=0,
            grid=grid,
            in_specs=[
                pl.BlockSpec((tt, b_tile, In), lambda bi, tb: (tb, bi, 0)),
                _invariant_spec((In, G4), lambda bi, tb: (0, 0)),
                _invariant_spec((H, G4), lambda bi, tb: (0, 0)),
                _invariant_spec((1, G4), lambda bi, tb: (0, 0)),
                _invariant_spec((H, O), lambda bi, tb: (0, 0)),
                _invariant_spec((1, O), lambda bi, tb: (0, 0)),
            ],
            out_specs=pl.BlockSpec((b_tile, O), lambda bi, tb: (bi, 0)),
            scratch_shapes=[
                pltpu.VMEM((tt, b_tile, G4), jnp.float32),
                pltpu.VMEM((b_tile, H), jnp.float32),
                pltpu.VMEM((b_tile, H), jnp.float32),
            ],
        ),
        compiler_params=pltpu.CompilerParams(
            dimension_semantics=("parallel", "arbitrary"),
            vmem_limit_bytes=vmem_limit,
        ),
    )(x, w_ih_t, w_hh_t, bias, w_out_t, b_out)


# ----------------------------------------------------------------------------
# Parameter init (PyTorch shapes, U(-1/sqrt(H), 1/sqrt(H))) + TPU preparation
# ----------------------------------------------------------------------------
def init_params(key, input_size, hidden, output_size, num_layers):
    scale = float(hidden) ** -0.5
    params = {"lstm": [], "linear": {}}
    for layer in range(num_layers):
        in_sz = input_size if layer == 0 else hidden
        key, k1, k2, k3, k4 = jax.random.split(key, 5)
        params["lstm"].append({
            "w_ih": jax.random.uniform(k1, (4 * hidden, in_sz), jnp.float32,
                                       -scale, scale),
            "w_hh": jax.random.uniform(k2, (4 * hidden, hidden), jnp.float32,
                                       -scale, scale),
            "b_ih": jax.random.uniform(k3, (4 * hidden,), jnp.float32,
                                       -scale, scale),
            "b_hh": jax.random.uniform(k4, (4 * hidden,), jnp.float32,
                                       -scale, scale),
        })
    key, k1, k2 = jax.random.split(key, 3)
    params["linear"] = {
        "w": jax.random.uniform(k1, (output_size, hidden), jnp.float32,
                                -scale, scale),
        "b": jax.random.uniform(k2, (output_size,), jnp.float32, -scale, scale),
    }
    return params


def _pad_and_reorder_gate_cols(w_t, H, H_pad):
    """(rows, 4H) in PyTorch gate order [i,f,g,o] -> (rows, 4*H_pad) in [i,f,o,g]."""
    rows = w_t.shape[0]
    w4 = w_t.reshape(rows, 4, H)
    w4 = w4[:, jnp.array([0, 1, 3, 2]), :]                  # [i,f,g,o] -> [i,f,o,g]
    w4 = jnp.pad(w4, ((0, 0), (0, 0), (0, H_pad - H)))
    return w4.reshape(rows, 4 * H_pad)


def _pad_rows(w, rows_pad):
    return jnp.pad(w, ((0, rows_pad - w.shape[0]), (0, 0)))


def prepare_params(raw, hidden):
    """Transpose, reorder gates, fold biases, zero-pad, and cast weights to bf16."""
    H = hidden
    H_pad = _round_up(H, _LANE)
    O = raw["linear"]["w"].shape[0]
    O_pad = _round_up(O, _LANE)
    prepared = {"lstm": [], "linear": {}}
    for li, layer in enumerate(raw["lstm"]):
        w_ih_t = _pad_and_reorder_gate_cols(layer["w_ih"].T, H, H_pad)
        w_hh_t = _pad_and_reorder_gate_cols(layer["w_hh"].T, H, H_pad)
        bias = _pad_and_reorder_gate_cols(
            (layer["b_ih"] + layer["b_hh"]).reshape(1, 4 * H), H, H_pad)
        if li > 0:
            w_ih_t = _pad_rows(w_ih_t, H_pad)     # previous layer's padded hidden
        w_hh_t = _pad_rows(w_hh_t, H_pad)
        prepared["lstm"].append({
            "w_ih_t": w_ih_t.astype(jnp.bfloat16),     # (In or H_pad, 4*H_pad)
            "w_hh_t": w_hh_t.astype(jnp.bfloat16),     # (H_pad, 4*H_pad)
            "bias": bias.astype(jnp.float32),          # (1, 4*H_pad)
        })
    w_out_t = _pad_rows(raw["linear"]["w"].T, H_pad)               # (H_pad, O)
    w_out_t = jnp.pad(w_out_t, ((0, 0), (0, O_pad - O)))           # lane-dense head
    b_out = jnp.pad(raw["linear"]["b"].reshape(1, -1), ((0, 0), (0, O_pad - O)))
    prepared["linear"] = {
        "w_t": w_out_t.astype(jnp.bfloat16),
        "bias": b_out.astype(jnp.float32),
        "out_features": O,
    }
    return prepared


# ----------------------------------------------------------------------------
# Full forward: LSTMModel.forward(input_seq)
# ----------------------------------------------------------------------------
def lstm_model_forward(params, input_seq_bti, *, time_block=32):
    """input_seq_bti: (B, T, input_size), batch_first like the PyTorch module."""
    B, T, In0 = input_seq_bti.shape
    H_pad = params["lstm"][0]["w_hh_t"].shape[0]
    O = params["linear"]["out_features"]
    O_pad = params["linear"]["w_t"].shape[1]

    b_tile, B_pad = _choose_batch_tile(B)
    vmem_limit = _vmem_limit_bytes()

    # Time-block size: start from time_block, shrink to fit the VMEM budget, then
    # balance so T is padded by at most tt-1 steps (padded steps are masked in the
    # last layer instead of collapsing tt for awkward T).
    tt = max(1, min(time_block, T))
    in_worst = max(In0, H_pad)
    while tt > 1 and _recurrent_vmem_bytes(tt, b_tile, in_worst, H_pad,
                                           O_pad) > 0.7 * vmem_limit:
        tt //= 2
    n_blocks = pl.cdiv(T, tt)
    tt = pl.cdiv(T, n_blocks)
    T_pad = tt * n_blocks

    # Inter-layer sequences are stored bf16 when the batch tile is bf16-tile
    # aligned (multiple of 16) or spans the whole padded batch; f32 otherwise.
    seq_dtype = (jnp.bfloat16 if (b_tile % 16 == 0 or b_tile == B_pad)
                 else jnp.float32)

    # batch_first -> time-major, plus batch / time zero padding (padded gate
    # pre-activations are 0, so padded hidden units / batch rows stay harmless).
    x = jnp.transpose(input_seq_bti, (1, 0, 2)).astype(jnp.float32)   # (T, B, In)
    x = jnp.pad(x, ((0, T_pad - T), (0, B_pad - B), (0, 0)))

    # TODO(synk): nn.LSTM inter-layer dropout is training-only; this eval forward
    #             applies no dropout (matches PyTorch .eval() semantics).
    num_layers = len(params["lstm"])
    seq = x
    out = None
    for li, lp in enumerate(params["lstm"]):
        if li < num_layers - 1:
            seq = _lstm_layer_seq(seq, lp["w_ih_t"], lp["w_hh_t"], lp["bias"],
                                  hidden_pad=H_pad, tt=tt, b_tile=b_tile,
                                  out_dtype=seq_dtype, vmem_limit=vmem_limit)
        else:
            out = _lstm_layer_last(seq, lp["w_ih_t"], lp["w_hh_t"], lp["bias"],
                                   params["linear"]["w_t"], params["linear"]["bias"],
                                   hidden_pad=H_pad, tt=tt, b_tile=b_tile,
                                   t_valid=T, vmem_limit=vmem_limit)
    return out[:B, :O]                     # strip batch / lane padding


# ----------------------------------------------------------------------------
# Pure-JAX references for correctness checking
# ----------------------------------------------------------------------------
def lstm_model_reference(raw, x):
    """Full-f32 PyTorch-eval-semantics reference."""
    B, T, _ = x.shape
    seq = x
    for layer in raw["lstm"]:
        w_ih, w_hh = layer["w_ih"], layer["w_hh"]
        b = layer["b_ih"] + layer["b_hh"]
        H = w_hh.shape[1]

        def step(carry, x_t, w_ih=w_ih, w_hh=w_hh, b=b, H=H):
            h, c = carry
            g = x_t @ w_ih.T + h @ w_hh.T + b
            i = jax.nn.sigmoid(g[:, 0 * H:1 * H])
            f = jax.nn.sigmoid(g[:, 1 * H:2 * H])
            gg = jnp.tanh(g[:, 2 * H:3 * H])
            o = jax.nn.sigmoid(g[:, 3 * H:4 * H])
            c = f * c + i * gg
            h = o * jnp.tanh(c)
            return (h, c), h

        init = (jnp.zeros((B, H), jnp.float32), jnp.zeros((B, H), jnp.float32))
        _, hs = jax.lax.scan(step, init, jnp.transpose(seq, (1, 0, 2)))
        seq = jnp.transpose(hs, (1, 0, 2))
    h_last = seq[:, -1, :]
    return h_last @ raw["linear"]["w"].T + raw["linear"]["b"]


def lstm_model_reference_quantized(raw, x):
    """Mirrors the kernel's numerics: bf16 weights and bf16 matmul inputs with f32
    accumulation, f32 elementwise math, bf16 inter-layer storage."""
    bf, f32 = jnp.bfloat16, jnp.float32
    B, T, _ = x.shape
    seq = x.astype(f32)
    n = len(raw["lstm"])
    h_last = None
    for li, layer in enumerate(raw["lstm"]):
        w_ih = layer["w_ih"].astype(bf)
        w_hh = layer["w_hh"].astype(bf)
        bias = (layer["b_ih"] + layer["b_hh"]).astype(f32)
        H = layer["w_hh"].shape[1]

        def step(carry, x_t, w_ih=w_ih, w_hh=w_hh, bias=bias, H=H):
            h, c = carry
            g = (jnp.dot(x_t.astype(bf), w_ih.T, preferred_element_type=f32)
                 + jnp.dot(h.astype(bf), w_hh.T, preferred_element_type=f32)
                 + bias)
            i = jax.nn.sigmoid(g[:, 0 * H:1 * H])
            f = jax.nn.sigmoid(g[:, 1 * H:2 * H])
            gg = jnp.tanh(g[:, 2 * H:3 * H])
            o = jax.nn.sigmoid(g[:, 3 * H:4 * H])
            c = f * c + i * gg
            h = o * jnp.tanh(c)
            return (h, c), h

        init = (jnp.zeros((B, H), f32), jnp.zeros((B, H), f32))
        (h_last, _), hs = jax.lax.scan(step, init, jnp.transpose(seq, (1, 0, 2)))
        if li < n - 1:
            seq = jnp.transpose(hs, (1, 0, 2)).astype(bf).astype(f32)
    w = raw["linear"]["w"].astype(bf)
    return (jnp.dot(h_last.astype(bf), w.T, preferred_element_type=f32)
            + raw["linear"]["b"])


if __name__ == "__main__":
    # Small shapes consistent with the module's forward.
    batch, seq_len = 2, 8
    input_size, hidden, output_size, num_layers = 4, 32, 4, 2

    key = jax.random.PRNGKey(0)
    key, pkey, xkey = jax.random.split(key, 3)

    raw_params = init_params(pkey, input_size, hidden, output_size, num_layers)
    params = prepare_params(raw_params, hidden)
    input_seq = jax.random.normal(xkey, (batch, seq_len, input_size),
                                  dtype=jnp.float32)

    preds = lstm_model_forward(params, input_seq)
    jax.block_until_ready(preds)
    assert preds.shape == (batch, output_size)

    # Exact-numerics reference (same bf16 weight / matmul-input quantization).
    ref_q = lstm_model_reference_quantized(raw_params, input_seq)
    jax.block_until_ready(ref_q)
    err_q = float(jnp.max(jnp.abs(preds - ref_q)))
    assert err_q < 1e-3, f"mismatch vs bf16-quantized reference: max |err| = {err_q}"

    # Loose sanity check against the full-f32 reference (bf16 weights drift a bit).
    ref_f = lstm_model_reference(raw_params, input_seq)
    jax.block_until_ready(ref_f)
    err_f = float(jnp.max(jnp.abs(preds - ref_f)))
    assert err_f < 5e-2, f"mismatch vs f32 reference: max |err| = {err_f}"

    print("KERNEL_OK")
</pallas_src>

<mosaic_0001>
module attributes {stable_mosaic.version = 11 : i64} {
  func.func @_lstm_seq_kernel(%arg0: i32, %arg1: i32, %arg2: memref<8x8x4xf32, #tpu.memory_space<vmem>>, %arg3: memref<4x512xbf16, #tpu.memory_space<vmem>>, %arg4: memref<128x512xbf16, #tpu.memory_space<vmem>>, %arg5: memref<1x512xf32, #tpu.memory_space<vmem>>, %arg6: memref<8x8x128xbf16, #tpu.memory_space<vmem>>, %arg7: memref<8x8x512xf32, #tpu.memory_space<vmem>>, %arg8: memref<8x128xf32, #tpu.memory_space<vmem>>, %arg9: memref<8x128xf32, #tpu.memory_space<vmem>>) attributes {dimension_semantics = [#tpu.dimension_semantics<parallel>, #tpu.dimension_semantics<arbitrary>], iteration_bounds = array<i64: 1, 1>, scalar_prefetch = 0 : i64, scratch_operands = 3 : i64, tpu.core_type = #tpu.core_type<tc>, window_params = [{transform_indices = @transform_0, window_bounds = array<i64: 8, 8, 4>}, {pipeline_mode = #tpu.pipeline_mode<synchronous>, transform_indices = @transform_1, window_bounds = array<i64: 4, 512>}, {pipeline_mode = #tpu.pipeline_mode<synchronous>, transform_indices = @transform_2, window_bounds = array<i64: 128, 512>}, {pipeline_mode = #tpu.pipeline_mode<synchronous>, transform_indices = @transform_3, window_bounds = array<i64: 1, 512>}, {transform_indices = @transform_4, window_bounds = array<i64: 8, 8, 128>}]} {
    %c0_i32 = arith.constant 0 : i32
    %0 = arith.cmpi eq, %arg1, %c0_i32 : i32
    %1 = arith.extui %0 : i1 to i32
    %c0_i32_0 = arith.constant 0 : i32
    %2 = arith.cmpi ne, %1, %c0_i32_0 : i32
    scf.if %2 {
      %cst_83 = arith.constant 0.000000e+00 : f32
      %241 = vector.broadcast %cst_83 : f32 to vector<8x128xf32>
      %c0_84 = arith.constant 0 : index
      %c0_85 = arith.constant 0 : index
      %242 = vector.load %arg8[%c0_84, %c0_85] : memref<8x128xf32, #tpu.memory_space<vmem>>, vector<8x128xf32>
      tpu.vector_store %arg8[%c0_84, %c0_85], %241 {strides = array<i32>} : memref<8x128xf32, #tpu.memory_space<vmem>>, vector<8x128xf32>,
      %cst_86 = arith.constant 0.000000e+00 : f32
      %243 = vector.broadcast %cst_86 : f32 to vector<8x128xf32>
      %c0_87 = arith.constant 0 : index
      %c0_88 = arith.constant 0 : index
      %244 = vector.load %arg9[%c0_87, %c0_88] : memref<8x128xf32, #tpu.memory_space<vmem>>, vector<8x128xf32>
      tpu.vector_store %arg9[%c0_87, %c0_88], %243 {strides = array<i32>} : memref<8x128xf32, #tpu.memory_space<vmem>>, vector<8x128xf32>,
    } else {
    }
    %c0 = arith.constant 0 : index
    %c0_1 = arith.constant 0 : index
    %c0_2 = arith.constant 0 : index
    %3 = vector.load %arg2[%c0, %c0_1, %c0_2] : memref<8x8x4xf32, #tpu.memory_space<vmem>>, vector<8x8x4xf32>
    %4 = vector.shape_cast %3 : vector<8x8x4xf32> to vector<64x4xf32>
    %5 = arith.truncf %4 : vector<64x4xf32> to vector<64x4xbf16>
    %c0_3 = arith.constant 0 : index
    %c0_4 = arith.constant 0 : index
    %6 = vector.load %arg3[%c0_3, %c0_4] : memref<4x512xbf16, #tpu.memory_space<vmem>>, vector<4x512xbf16>
    %cst = arith.constant dense<0.000000e+00> : vector<64x512xf32>
    %7 = tpu.matmul %5, %6, %cst {dimension_numbers = #tpu.dot_dimension_numbers<[1], [0], [0], [1], [0, 0, 1, 1], [], []>} : vector<64x4xbf16>, vector<4x512xbf16>, vector<64x512xf32> -> vector<64x512xf32>
    %c0_5 = arith.constant 0 : index
    %c0_6 = arith.constant 0 : index
    %8 = vector.load %arg5[%c0_5, %c0_6] : memref<1x512xf32, #tpu.memory_space<vmem>>, vector<1x512xf32>
    %9 = vector.broadcast %8 : vector<1x512xf32> to vector<64x512xf32>
    %10 = arith.addf %7, %9 : vector<64x512xf32>
    %11 = vector.shape_cast %10 : vector<64x512xf32> to vector<8x8x512xf32>
    %c0_7 = arith.constant 0 : index
    %c0_8 = arith.constant 0 : index
    %c0_9 = arith.constant 0 : index
    %12 = vector.load %arg7[%c0_7, %c0_8, %c0_9] : memref<8x8x512xf32, #tpu.memory_space<vmem>>, vector<8x8x512xf32>
    tpu.vector_store %arg7[%c0_7, %c0_8, %c0_9], %11 {strides = array<i32>} : memref<8x8x512xf32, #tpu.memory_space<vmem>>, vector<8x8x512xf32>,
    %c0_10 = arith.constant 0 : index
    %c0_11 = arith.constant 0 : index
    %13 = vector.load %arg8[%c0_10, %c0_11] : memref<8x128xf32, #tpu.memory_space<vmem>>, vector<8x128xf32>
    %c0_12 = arith.constant 0 : index
    %c0_13 = arith.constant 0 : index
    %14 = vector.load %arg9[%c0_12, %c0_13] : memref<8x128xf32, #tpu.memory_space<vmem>>, vector<8x128xf32>
    %c0_i32_14 = arith.constant 0 : i32
    %15 = arith.index_cast %c0_i32_14 : i32 to index
    %c0_15 = arith.constant 0 : index
    %c0_16 = arith.constant 0 : index
    %16 = vector.load %arg7[%15, %c0_15, %c0_16] : memref<8x8x512xf32, #tpu.memory_space<vmem>>, vector<1x8x512xf32>
    %17 = vector.shape_cast %16 : vector<1x8x512xf32> to vector<8x512xf32>
    %18 = arith.truncf %13 : vector<8x128xf32> to vector<8x128xbf16>
    %c0_17 = arith.constant 0 : index
    %c0_18 = arith.constant 0 : index
    %19 = vector.load %arg4[%c0_17, %c0_18] : memref<128x512xbf16, #tpu.memory_space<vmem>>, vector<128x512xbf16>
    %cst_19 = arith.constant dense<0.000000e+00> : vector<8x512xf32>
    %20 = tpu.matmul %18, %19, %cst_19 {dimension_numbers = #tpu.dot_dimension_numbers<[1], [0], [0], [1], [0, 0, 1, 1], [], []>} : vector<8x128xbf16>, vector<128x512xbf16>, vector<8x512xf32> -> vector<8x512xf32>
    %21 = arith.addf %17, %20 : vector<8x512xf32>
    %22 = vector.extract_strided_slice %21 {offsets = [0, 0], sizes = [8, 384], strides = [1, 1]} : vector<8x512xf32> to vector<8x384xf32>
    %23 = arith.negf %22 : vector<8x384xf32>
    %24 = math.exp %23 : vector<8x384xf32>
    %cst_20 = arith.constant 1.000000e+00 : f32
    %25 = vector.broadcast %cst_20 : f32 to vector<8x384xf32>
    %26 = arith.addf %25, %24 : vector<8x384xf32>
    %27 = arith.divf %25, %26 : vector<8x384xf32>
    %28 = vector.extract_strided_slice %21 {offsets = [0, 384], sizes = [8, 128], strides = [1, 1]} : vector<8x512xf32> to vector<8x128xf32>
    %29 = math.tanh %28 : vector<8x128xf32>
    %30 = vector.extract_strided_slice %27 {offsets = [0, 0], sizes = [8, 128], strides = [1, 1]} : vector<8x384xf32> to vector<8x128xf32>
    %31 = vector.extract_strided_slice %27 {offsets = [0, 128], sizes = [8, 128], strides = [1, 1]} : vector<8x384xf32> to vector<8x128xf32>
    %32 = vector.extract_strided_slice %27 {offsets = [0, 256], sizes = [8, 128], strides = [1, 1]} : vector<8x384xf32> to vector<8x128xf32>
    %33 = arith.mulf %31, %14 : vector<8x128xf32>
    %34 = arith.mulf %30, %29 : vector<8x128xf32>
    %35 = arith.addf %33, %34 : vector<8x128xf32>
    %36 = math.tanh %35 : vector<8x128xf32>
    %37 = arith.mulf %32, %36 : vector<8x128xf32>
    %38 = arith.truncf %37 : vector<8x128xf32> to vector<8x128xbf16>
    %39 = arith.index_cast %c0_i32_14 : i32 to index
    %c0_21 = arith.constant 0 : index
    %c0_22 = arith.constant 0 : index
    %40 = vector.load %arg6[%39, %c0_21, %c0_22] : memref<8x8x128xbf16, #tpu.memory_space<vmem>>, vector<1x8x128xbf16>
    %41 = vector.shape_cast %40 : vector<1x8x128xbf16> to vector<8x128xbf16>
    %42 = vector.shape_cast %38 : vector<8x128xbf16> to vector<1x8x128xbf16>
    tpu.vector_store %arg6[%39, %c0_21, %c0_22], %42 {strides = array<i32>} : memref<8x8x128xbf16, #tpu.memory_space<vmem>>, vector<1x8x128xbf16>,
    %c1_i32 = arith.constant 1 : i32
    %43 = arith.index_cast %c1_i32 : i32 to index
    %c0_23 = arith.constant 0 : index
    %c0_24 = arith.constant 0 : index
    %44 = vector.load %arg7[%43, %c0_23, %c0_24] : memref<8x8x512xf32, #tpu.memory_space<vmem>>, vector<1x8x512xf32>
    %45 = vector.shape_cast %44 : vector<1x8x512xf32> to vector<8x512xf32>
    %46 = arith.truncf %37 : vector<8x128xf32> to vector<8x128xbf16>
    %c0_25 = arith.constant 0 : index
    %c0_26 = arith.constant 0 : index
    %47 = vector.load %arg4[%c0_25, %c0_26] : memref<128x512xbf16, #tpu.memory_space<vmem>>, vector<128x512xbf16>
    %cst_27 = arith.constant dense<0.000000e+00> : vector<8x512xf32>
    %48 = tpu.matmul %46, %47, %cst_27 {dimension_numbers = #tpu.dot_dimension_numbers<[1], [0], [0], [1], [0, 0, 1, 1], [], []>} : vector<8x128xbf16>, vector<128x512xbf16>, vector<8x512xf32> -> vector<8x512xf32>
    %49 = arith.addf %45, %48 : vector<8x512xf32>
    %50 = vector.extract_strided_slice %49 {offsets = [0, 0], sizes = [8, 384], strides = [1, 1]} : vector<8x512xf32> to vector<8x384xf32>
    %51 = arith.negf %50 : vector<8x384xf32>
    %52 = math.exp %51 : vector<8x384xf32>
    %cst_28 = arith.constant 1.000000e+00 : f32
    %53 = vector.broadcast %cst_28 : f32 to vector<8x384xf32>
    %54 = arith.addf %53, %52 : vector<8x384xf32>
    %55 = arith.divf %53, %54 : vector<8x384xf32>
    %56 = vector.extract_strided_slice %49 {offsets = [0, 384], sizes = [8, 128], strides = [1, 1]} : vector<8x512xf32> to vector<8x128xf32>
    %57 = math.tanh %56 : vector<8x128xf32>
    %58 = vector.extract_strided_slice %55 {offsets = [0, 0], sizes = [8, 128], strides = [1, 1]} : vector<8x384xf32> to vector<8x128xf32>
    %59 = vector.extract_strided_slice %55 {offsets = [0, 128], sizes = [8, 128], strides = [1, 1]} : vector<8x384xf32> to vector<8x128xf32>
    %60 = vector.extract_strided_slice %55 {offsets = [0, 256], sizes = [8, 128], strides = [1, 1]} : vector<8x384xf32> to vector<8x128xf32>
    %61 = arith.mulf %59, %35 : vector<8x128xf32>
    %62 = arith.mulf %58, %57 : vector<8x128xf32>
    %63 = arith.addf %61, %62 : vector<8x128xf32>
    %64 = math.tanh %63 : vector<8x128xf32>
    %65 = arith.mulf %60, %64 : vector<8x128xf32>
    %66 = arith.truncf %65 : vector<8x128xf32> to vector<8x128xbf16>
    %67 = arith.index_cast %c1_i32 : i32 to index
    %c0_29 = arith.constant 0 : index
    %c0_30 = arith.constant 0 : index
    %68 = vector.load %arg6[%67, %c0_29, %c0_30] : memref<8x8x128xbf16, #tpu.memory_space<vmem>>, vector<1x8x128xbf16>
    %69 = vector.shape_cast %68 : vector<1x8x128xbf16> to vector<8x128xbf16>
    %70 = vector.shape_cast %66 : vector<8x128xbf16> to vector<1x8x128xbf16>
    tpu.vector_store %arg6[%67, %c0_29, %c0_30], %70 {strides = array<i32>} : memref<8x8x128xbf16, #tpu.memory_space<vmem>>, vector<1x8x128xbf16>,
    %c2_i32 = arith.constant 2 : i32
    %71 = arith.index_cast %c2_i32 : i32 to index
    %c0_31 = arith.constant 0 : index
    %c0_32 = arith.constant 0 : index
    %72 = vector.load %arg7[%71, %c0_31, %c0_32] : memref<8x8x512xf32, #tpu.memory_space<vmem>>, vector<1x8x512xf32>
    %73 = vector.shape_cast %72 : vector<1x8x512xf32> to vector<8x512xf32>
    %74 = arith.truncf %65 : vector<8x128xf32> to vector<8x128xbf16>
    %c0_33 = arith.constant 0 : index
    %c0_34 = arith.constant 0 : index
    %75 = vector.load %arg4[%c0_33, %c0_34] : memref<128x512xbf16, #tpu.memory_space<vmem>>, vector<128x512xbf16>
    %cst_35 = arith.constant dense<0.000000e+00> : vector<8x512xf32>
    %76 = tpu.matmul %74, %75, %cst_35 {dimension_numbers = #tpu.dot_dimension_numbers<[1], [0], [0], [1], [0, 0, 1, 1], [], []>} : vector<8x128xbf16>, vector<128x512xbf16>, vector<8x512xf32> -> vector<8x512xf32>
    %77 = arith.addf %73, %76 : vector<8x512xf32>
    %78 = vector.extract_strided_slice %77 {offsets = [0, 0], sizes = [8, 384], strides = [1, 1]} : vector<8x512xf32> to vector<8x384xf32>
    %79 = arith.negf %78 : vector<8x384xf32>
    %80 = math.exp %79 : vector<8x384xf32>
    %cst_36 = arith.constant 1.000000e+00 : f32
    %81 = vector.broadcast %cst_36 : f32 to vector<8x384xf32>
    %82 = arith.addf %81, %80 : vector<8x384xf32>
    %83 = arith.divf %81, %82 : vector<8x384xf32>
    %84 = vector.extract_strided_slice %77 {offsets = [0, 384], sizes = [8, 128], strides = [1, 1]} : vector<8x512xf32> to vector<8x128xf32>
    %85 = math.tanh %84 : vector<8x128xf32>
    %86 = vector.extract_strided_slice %83 {offsets = [0, 0], sizes = [8, 128], strides = [1, 1]} : vector<8x384xf32> to vector<8x128xf32>
    %87 = vector.extract_strided_slice %83 {offsets = [0, 128], sizes = [8, 128], strides = [1, 1]} : vector<8x384xf32> to vector<8x128xf32>
    %88 = vector.extract_strided_slice %83 {offsets = [0, 256], sizes = [8, 128], strides = [1, 1]} : vector<8x384xf32> to vector<8x128xf32>
    %89 = arith.mulf %87, %63 : vector<8x128xf32>
    %90 = arith.mulf %86, %85 : vector<8x128xf32>
    %91 = arith.addf %89, %90 : vector<8x128xf32>
    %92 = math.tanh %91 : vector<8x128xf32>
    %93 = arith.mulf %88, %92 : vector<8x128xf32>
    %94 = arith.truncf %93 : vector<8x128xf32> to vector<8x128xbf16>
    %95 = arith.index_cast %c2_i32 : i32 to index
    %c0_37 = arith.constant 0 : index
    %c0_38 = arith.constant 0 : index
    %96 = vector.load %arg6[%95, %c0_37, %c0_38] : memref<8x8x128xbf16, #tpu.memory_space<vmem>>, vector<1x8x128xbf16>
    %97 = vector.shape_cast %96 : vector<1x8x128xbf16> to vector<8x128xbf16>
    %98 = vector.shape_cast %94 : vector<8x128xbf16> to vector<1x8x128xbf16>
    tpu.vector_store %arg6[%95, %c0_37, %c0_38], %98 {strides = array<i32>} : memref<8x8x128xbf16, #tpu.memory_space<vmem>>, vector<1x8x128xbf16>,
    %c3_i32 = arith.constant 3 : i32
    %99 = arith.index_cast %c3_i32 : i32 to index
    %c0_39 = arith.constant 0 : index
    %c0_40 = arith.constant 0 : index
    %100 = vector.load %arg7[%99, %c0_39, %c0_40] : memref<8x8x512xf32, #tpu.memory_space<vmem>>, vector<1x8x512xf32>
    %101 = vector.shape_cast %100 : vector<1x8x512xf32> to vector<8x512xf32>
    %102 = arith.truncf %93 : vector<8x128xf32> to vector<8x128xbf16>
    %c0_41 = arith.constant 0 : index
    %c0_42 = arith.constant 0 : index
    %103 = vector.load %arg4[%c0_41, %c0_42] : memref<128x512xbf16, #tpu.memory_space<vmem>>, vector<128x512xbf16>
    %cst_43 = arith.constant dense<0.000000e+00> : vector<8x512xf32>
    %104 = tpu.matmul %102, %103, %cst_43 {dimension_numbers = #tpu.dot_dimension_numbers<[1], [0], [0], [1], [0, 0, 1, 1], [], []>} : vector<8x128xbf16>, vector<128x512xbf16>, vector<8x512xf32> -> vector<8x512xf32>
    %105 = arith.addf %101, %104 : vector<8x512xf32>
    %106 = vector.extract_strided_slice %105 {offsets = [0, 0], sizes = [8, 384], strides = [1, 1]} : vector<8x512xf32> to vector<8x384xf32>
    %107 = arith.negf %106 : vector<8x384xf32>
    %108 = math.exp %107 : vector<8x384xf32>
    %cst_44 = arith.constant 1.000000e+00 : f32
    %109 = vector.broadcast %cst_44 : f32 to vector<8x384xf32>
    %110 = arith.addf %109, %108 : vector<8x384xf32>
    %111 = arith.divf %109, %110 : vector<8x384xf32>
    %112 = vector.extract_strided_slice %105 {offsets = [0, 384], sizes = [8, 128], strides = [1, 1]} : vector<8x512xf32> to vector<8x128xf32>
    %113 = math.tanh %112 : vector<8x128xf32>
    %114 = vector.extract_strided_slice %111 {offsets = [0, 0], sizes = [8, 128], strides = [1, 1]} : vector<8x384xf32> to vector<8x128xf32>
    %115 = vector.extract_strided_slice %111 {offsets = [0, 128], sizes = [8, 128], strides = [1, 1]} : vector<8x384xf32> to vector<8x128xf32>
    %116 = vector.extract_strided_slice %111 {offsets = [0, 256], sizes = [8, 128], strides = [1, 1]} : vector<8x384xf32> to vector<8x128xf32>
    %117 = arith.mulf %115, %91 : vector<8x128xf32>
    %118 = arith.mulf %114, %113 : vector<8x128xf32>
    %119 = arith.addf %117, %118 : vector<8x128xf32>
    %120 = math.tanh %119 : vector<8x128xf32>
    %121 = arith.mulf %116, %120 : vector<8x128xf32>
    %122 = arith.truncf %121 : vector<8x128xf32> to vector<8x128xbf16>
    %123 = arith.index_cast %c3_i32 : i32 to index
    %c0_45 = arith.constant 0 : index
    %c0_46 = arith.constant 0 : index
    %124 = vector.load %arg6[%123, %c0_45, %c0_46] : memref<8x8x128xbf16, #tpu.memory_space<vmem>>, vector<1x8x128xbf16>
    %125 = vector.shape_cast %124 : vector<1x8x128xbf16> to vector<8x128xbf16>
    %126 = vector.shape_cast %122 : vector<8x128xbf16> to vector<1x8x128xbf16>
    tpu.vector_store %arg6[%123, %c0_45, %c0_46], %126 {strides = array<i32>} : memref<8x8x128xbf16, #tpu.memory_space<vmem>>, vector<1x8x128xbf16>,
    %c4_i32 = arith.constant 4 : i32
    %127 = arith.index_cast %c4_i32 : i32 to index
    %c0_47 = arith.constant 0 : index
    %c0_48 = arith.constant 0 : index
    %128 = vector.load %arg7[%127, %c0_47, %c0_48] : memref<8x8x512xf32, #tpu.memory_space<vmem>>, vector<1x8x512xf32>
    %129 = vector.shape_cast %128 : vector<1x8x512xf32> to vector<8x512xf32>
    %130 = arith.truncf %121 : vector<8x128xf32> to vector<8x128xbf16>
    %c0_49 = arith.constant 0 : index
    %c0_50 = arith.constant 0 : index
    %131 = vector.load %arg4[%c0_49, %c0_50] : memref<128x512xbf16, #tpu.memory_space<vmem>>, vector<128x512xbf16>
    %cst_51 = arith.constant dense<0.000000e+00> : vector<8x512xf32>
    %132 = tpu.matmul %130, %131, %cst_51 {dimension_numbers = #tpu.dot_dimension_numbers<[1], [0], [0], [1], [0, 0, 1, 1], [], []>} : vector<8x128xbf16>, vector<128x512xbf16>, vector<8x512xf32> -> vector<8x512xf32>
    %133 = arith.addf %129, %132 : vector<8x512xf32>
    %134 = vector.extract_strided_slice %133 {offsets = [0, 0], sizes = [8, 384], strides = [1, 1]} : vector<8x512xf32> to vector<8x384xf32>
    %135 = arith.negf %134 : vector<8x384xf32>
    %136 = math.exp %135 : vector<8x384xf32>
    %cst_52 = arith.constant 1.000000e+00 : f32
    %137 = vector.broadcast %cst_52 : f32 to vector<8x384xf32>
    %138 = arith.addf %137, %136 : vector<8x384xf32>
    %139 = arith.divf %137, %138 : vector<8x384xf32>
    %140 = vector.extract_strided_slice %133 {offsets = [0, 384], sizes = [8, 128], strides = [1, 1]} : vector<8x512xf32> to vector<8x128xf32>
    %141 = math.tanh %140 : vector<8x128xf32>
    %142 = vector.extract_strided_slice %139 {offsets = [0, 0], sizes = [8, 128], strides = [1, 1]} : vector<8x384xf32> to vector<8x128xf32>
    %143 = vector.extract_strided_slice %139 {offsets = [0, 128], sizes = [8, 128], strides = [1, 1]} : vector<8x384xf32> to vector<8x128xf32>
    %144 = vector.extract_strided_slice %139 {offsets = [0, 256], sizes = [8, 128], strides = [1, 1]} : vector<8x384xf32> to vector<8x128xf32>
    %145 = arith.mulf %143, %119 : vector<8x128xf32>
    %146 = arith.mulf %142, %141 : vector<8x128xf32>
    %147 = arith.addf %145, %146 : vector<8x128xf32>
    %148 = math.tanh %147 : vector<8x128xf32>
    %149 = arith.mulf %144, %148 : vector<8x128xf32>
    %150 = arith.truncf %149 : vector<8x128xf32> to vector<8x128xbf16>
    %151 = arith.index_cast %c4_i32 : i32 to index
    %c0_53 = arith.constant 0 : index
    %c0_54 = arith.constant 0 : index
    %152 = vector.load %arg6[%151, %c0_53, %c0_54] : memref<8x8x128xbf16, #tpu.memory_space<vmem>>, vector<1x8x128xbf16>
    %153 = vector.shape_cast %152 : vector<1x8x128xbf16> to vector<8x128xbf16>
    %154 = vector.shape_cast %150 : vector<8x128xbf16> to vector<1x8x128xbf16>
    tpu.vector_store %arg6[%151, %c0_53, %c0_54], %154 {strides = array<i32>} : memref<8x8x128xbf16, #tpu.memory_space<vmem>>, vector<1x8x128xbf16>,
    %c5_i32 = arith.constant 5 : i32
    %155 = arith.index_cast %c5_i32 : i32 to index
    %c0_55 = arith.constant 0 : index
    %c0_56 = arith.constant 0 : index
    %156 = vector.load %arg7[%155, %c0_55, %c0_56] : memref<8x8x512xf32, #tpu.memory_space<vmem>>, vector<1x8x512xf32>
    %157 = vector.shape_cast %156 : vector<1x8x512xf32> to vector<8x512xf32>
    %158 = arith.truncf %149 : vector<8x128xf32> to vector<8x128xbf16>
    %c0_57 = arith.constant 0 : index
    %c0_58 = arith.constant 0 : index
    %159 = vector.load %arg4[%c0_57, %c0_58] : memref<128x512xbf16, #tpu.memory_space<vmem>>, vector<128x512xbf16>
    %cst_59 = arith.constant dense<0.000000e+00> : vector<8x512xf32>
    %160 = tpu.matmul %158, %159, %cst_59 {dimension_numbers = #tpu.dot_dimension_numbers<[1], [0], [0], [1], [0, 0, 1, 1], [], []>} : vector<8x128xbf16>, vector<128x512xbf16>, vector<8x512xf32> -> vector<8x512xf32>
    %161 = arith.addf %157, %160 : vector<8x512xf32>
    %162 = vector.extract_strided_slice %161 {offsets = [0, 0], sizes = [8, 384], strides = [1, 1]} : vector<8x512xf32> to vector<8x384xf32>
    %163 = arith.negf %162 : vector<8x384xf32>
    %164 = math.exp %163 : vector<8x384xf32>
    %cst_60 = arith.constant 1.000000e+00 : f32
    %165 = vector.broadcast %cst_60 : f32 to vector<8x384xf32>
    %166 = arith.addf %165, %164 : vector<8x384xf32>
    %167 = arith.divf %165, %166 : vector<8x384xf32>
    %168 = vector.extract_strided_slice %161 {offsets = [0, 384], sizes = [8, 128], strides = [1, 1]} : vector<8x512xf32> to vector<8x128xf32>
    %169 = math.tanh %168 : vector<8x128xf32>
    %170 = vector.extract_strided_slice %167 {offsets = [0, 0], sizes = [8, 128], strides = [1, 1]} : vector<8x384xf32> to vector<8x128xf32>
    %171 = vector.extract_strided_slice %167 {offsets = [0, 128], sizes = [8, 128], strides = [1, 1]} : vector<8x384xf32> to vector<8x128xf32>
    %172 = vector.extract_strided_slice %167 {offsets = [0, 256], sizes = [8, 128], strides = [1, 1]} : vector<8x384xf32> to vector<8x128xf32>
    %173 = arith.mulf %171, %147 : vector<8x128xf32>
    %174 = arith.mulf %170, %169 : vector<8x128xf32>
    %175 = arith.addf %173, %174 : vector<8x128xf32>
    %176 = math.tanh %175 : vector<8x128xf32>
    %177 = arith.mulf %172, %176 : vector<8x128xf32>
    %178 = arith.truncf %177 : vector<8x128xf32> to vector<8x128xbf16>
    %179 = arith.index_cast %c5_i32 : i32 to index
    %c0_61 = arith.constant 0 : index
    %c0_62 = arith.constant 0 : index
    %180 = vector.load %arg6[%179, %c0_61, %c0_62] : memref<8x8x128xbf16, #tpu.memory_space<vmem>>, vector<1x8x128xbf16>
    %181 = vector.shape_cast %180 : vector<1x8x128xbf16> to vector<8x128xbf16>
    %182 = vector.shape_cast %178 : vector<8x128xbf16> to vector<1x8x128xbf16>
    tpu.vector_store %arg6[%179, %c0_61, %c0_62], %182 {strides = array<i32>} : memref<8x8x128xbf16, #tpu.memory_space<vmem>>, vector<1x8x128xbf16>,
    %c6_i32 = arith.constant 6 : i32
    %183 = arith.index_cast %c6_i32 : i32 to index
    %c0_63 = arith.constant 0 : index
    %c0_64 = arith.constant 0 : index
    %184 = vector.load %arg7[%183, %c0_63, %c0_64] : memref<8x8x512xf32, #tpu.memory_space<vmem>>, vector<1x8x512xf32>
    %185 = vector.shape_cast %184 : vector<1x8x512xf32> to vector<8x512xf32>
    %186 = arith.truncf %177 : vector<8x128xf32> to vector<8x128xbf16>
    %c0_65 = arith.constant 0 : index
    %c0_66 = arith.constant 0 : index
    %187 = vector.load %arg4[%c0_65, %c0_66] : memref<128x512xbf16, #tpu.memory_space<vmem>>, vector<128x512xbf16>
    %cst_67 = arith.constant dense<0.000000e+00> : vector<8x512xf32>
    %188 = tpu.matmul %186, %187, %cst_67 {dimension_numbers = #tpu.dot_dimension_numbers<[1], [0], [0], [1], [0, 0, 1, 1], [], []>} : vector<8x128xbf16>, vector<128x512xbf16>, vector<8x512xf32> -> vector<8x512xf32>
    %189 = arith.addf %185, %188 : vector<8x512xf32>
    %190 = vector.extract_strided_slice %189 {offsets = [0, 0], sizes = [8, 384], strides = [1, 1]} : vector<8x512xf32> to vector<8x384xf32>
    %191 = arith.negf %190 : vector<8x384xf32>
    %192 = math.exp %191 : vector<8x384xf32>
    %cst_68 = arith.constant 1.000000e+00 : f32
    %193 = vector.broadcast %cst_68 : f32 to vector<8x384xf32>
    %194 = arith.addf %193, %192 : vector<8x384xf32>
    %195 = arith.divf %193, %194 : vector<8x384xf32>
    %196 = vector.extract_strided_slice %189 {offsets = [0, 384], sizes = [8, 128], strides = [1, 1]} : vector<8x512xf32> to vector<8x128xf32>
    %197 = math.tanh %196 : vector<8x128xf32>
    %198 = vector.extract_strided_slice %195 {offsets = [0, 0], sizes = [8, 128], strides = [1, 1]} : vector<8x384xf32> to vector<8x128xf32>
    %199 = vector.extract_strided_slice %195 {offsets = [0, 128], sizes = [8, 128], strides = [1, 1]} : vector<8x384xf32> to vector<8x128xf32>
    %200 = vector.extract_strided_slice %195 {offsets = [0, 256], sizes = [8, 128], strides = [1, 1]} : vector<8x384xf32> to vector<8x128xf32>
    %201 = arith.mulf %199, %175 : vector<8x128xf32>
    %202 = arith.mulf %198, %197 : vector<8x128xf32>
    %203 = arith.addf %201, %202 : vector<8x128xf32>
    %204 = math.tanh %203 : vector<8x128xf32>
    %205 = arith.mulf %200, %204 : vector<8x128xf32>
    %206 = arith.truncf %205 : vector<8x128xf32> to vector<8x128xbf16>
    %207 = arith.index_cast %c6_i32 : i32 to index
    %c0_69 = arith.constant 0 : index
    %c0_70 = arith.constant 0 : index
    %208 = vector.load %arg6[%207, %c0_69, %c0_70] : memref<8x8x128xbf16, #tpu.memory_space<vmem>>, vector<1x8x128xbf16>
    %209 = vector.shape_cast %208 : vector<1x8x128xbf16> to vector<8x128xbf16>
    %210 = vector.shape_cast %206 : vector<8x128xbf16> to vector<1x8x128xbf16>
    tpu.vector_store %arg6[%207, %c0_69, %c0_70], %210 {strides = array<i32>} : memref<8x8x128xbf16, #tpu.memory_space<vmem>>, vector<1x8x128xbf16>,
    %c7_i32 = arith.constant 7 : i32
    %211 = arith.index_cast %c7_i32 : i32 to index
    %c0_71 = arith.constant 0 : index
    %c0_72 = arith.constant 0 : index
    %212 = vector.load %arg7[%211, %c0_71, %c0_72] : memref<8x8x512xf32, #tpu.memory_space<vmem>>, vector<1x8x512xf32>
    %213 = vector.shape_cast %212 : vector<1x8x512xf32> to vector<8x512xf32>
    %214 = arith.truncf %205 : vector<8x128xf32> to vector<8x128xbf16>
    %c0_73 = arith.constant 0 : index
    %c0_74 = arith.constant 0 : index
    %215 = vector.load %arg4[%c0_73, %c0_74] : memref<128x512xbf16, #tpu.memory_space<vmem>>, vector<128x512xbf16>
    %cst_75 = arith.constant dense<0.000000e+00> : vector<8x512xf32>
    %216 = tpu.matmul %214, %215, %cst_75 {dimension_numbers = #tpu.dot_dimension_numbers<[1], [0], [0], [1], [0, 0, 1, 1], [], []>} : vector<8x128xbf16>, vector<128x512xbf16>, vector<8x512xf32> -> vector<8x512xf32>
    %217 = arith.addf %213, %216 : vector<8x512xf32>
    %218 = vector.extract_strided_slice %217 {offsets = [0, 0], sizes = [8, 384], strides = [1, 1]} : vector<8x512xf32> to vector<8x384xf32>
    %219 = arith.negf %218 : vector<8x384xf32>
    %220 = math.exp %219 : vector<8x384xf32>
    %cst_76 = arith.constant 1.000000e+00 : f32
    %221 = vector.broadcast %cst_76 : f32 to vector<8x384xf32>
    %222 = arith.addf %221, %220 : vector<8x384xf32>
    %223 = arith.divf %221, %222 : vector<8x384xf32>
    %224 = vector.extract_strided_slice %217 {offsets = [0, 384], sizes = [8, 128], strides = [1, 1]} : vector<8x512xf32> to vector<8x128xf32>
    %225 = math.tanh %224 : vector<8x128xf32>
    %226 = vector.extract_strided_slice %223 {offsets = [0, 0], sizes = [8, 128], strides = [1, 1]} : vector<8x384xf32> to vector<8x128xf32>
    %227 = vector.extract_strided_slice %223 {offsets = [0, 128], sizes = [8, 128], strides = [1, 1]} : vector<8x384xf32> to vector<8x128xf32>
    %228 = vector.extract_strided_slice %223 {offsets = [0, 256], sizes = [8, 128], strides = [1, 1]} : vector<8x384xf32> to vector<8x128xf32>
    %229 = arith.mulf %227, %203 : vector<8x128xf32>
    %230 = arith.mulf %226, %225 : vector<8x128xf32>
    %231 = arith.addf %229, %230 : vector<8x128xf32>
    %232 = math.tanh %231 : vector<8x128xf32>
    %233 = arith.mulf %228, %232 : vector<8x128xf32>
    %234 = arith.truncf %233 : vector<8x128xf32> to vector<8x128xbf16>
    %235 = arith.index_cast %c7_i32 : i32 to index
    %c0_77 = arith.constant 0 : index
    %c0_78 = arith.constant 0 : index
    %236 = vector.load %arg6[%235, %c0_77, %c0_78] : memref<8x8x128xbf16, #tpu.memory_space<vmem>>, vector<1x8x128xbf16>
    %237 = vector.shape_cast %236 : vector<1x8x128xbf16> to vector<8x128xbf16>
    %238 = vector.shape_cast %234 : vector<8x128xbf16> to vector<1x8x128xbf16>
    tpu.vector_store %arg6[%235, %c0_77, %c0_78], %238 {strides = array<i32>} : memref<8x8x128xbf16, #tpu.memory_space<vmem>>, vector<1x8x128xbf16>,
    %c8_i32 = arith.constant 8 : i32
    %c0_79 = arith.constant 0 : index
    %c0_80 = arith.constant 0 : index
    %239 = vector.load %arg8[%c0_79, %c0_80] : memref<8x128xf32, #tpu.memory_space<vmem>>, vector<8x128xf32>
    tpu.vector_store %arg8[%c0_79, %c0_80], %233 {strides = array<i32>} : memref<8x128xf32, #tpu.memory_space<vmem>>, vector<8x128xf32>,
    %c0_81 = arith.constant 0 : index
    %c0_82 = arith.constant 0 : index
    %240 = vector.load %arg9[%c0_81, %c0_82] : memref<8x128xf32, #tpu.memory_space<vmem>>, vector<8x128xf32>
    tpu.vector_store %arg9[%c0_81, %c0_82], %231 {strides = array<i32>} : memref<8x128xf32, #tpu.memory_space<vmem>>, vector<8x128xf32>,
    return
  }
  func.func @transform_0(%arg0: i32, %arg1: i32) -> (i32, i32, i32) {
    %c0_i32 = arith.constant 0 : i32
    %c0_i32_0 = arith.constant 0 : i32
    return %arg1, %arg0, %c0_i32 : i32, i32, i32
  }
  func.func @transform_1(%arg0: i32, %arg1: i32) -> (i32, i32) {
    %c0_i32 = arith.constant 0 : i32
    %c0_i32_0 = arith.constant 0 : i32
    %c0_i32_1 = arith.constant 0 : i32
    return %c0_i32, %c0_i32_0 : i32, i32
  }
  func.func @transform_2(%arg0: i32, %arg1: i32) -> (i32, i32) {
    %c0_i32 = arith.constant 0 : i32
    %c0_i32_0 = arith.constant 0 : i32
    %c0_i32_1 = arith.constant 0 : i32
    return %c0_i32, %c0_i32_0 : i32, i32
  }
  func.func @transform_3(%arg0: i32, %arg1: i32) -> (i32, i32) {
    %c0_i32 = arith.constant 0 : i32
    %c0_i32_0 = arith.constant 0 : i32
    %c0_i32_1 = arith.constant 0 : i32
    return %c0_i32, %c0_i32_0 : i32, i32
  }
  func.func @transform_4(%arg0: i32, %arg1: i32) -> (i32, i32, i32) {
    %c0_i32 = arith.constant 0 : i32
    %c0_i32_0 = arith.constant 0 : i32
    return %arg1, %arg0, %c0_i32 : i32, i32, i32
  }
}

</mosaic_0001>

<bundles_post_ra>
// kernel: tpu_custom_call.1
= control target key start
LH: loop header
LB: loop body
LE: loop exit
PB: predicated region body
PF: predicated region fallthrough
CT: control target
= control target key end

     0   :  { %9 = vsyncpa [#allocation6], 0  ;;  %s3998_s0 = inlined_call_operand.vmem [shape: f32[8,8,4], index: 0, kind: input, shape index: {}]   ;;  %s3999_s1 = inlined_call_operand.vmem [shape: bf16[4,512], index: 1, kind: input, shape index: {}]   ;;  %s4000_s2 = inlined_call_operand.hbm [shape: bf16[128,512], index: 2, kind: input, shape index: {}]   ;;  %s4001_s3 = inlined_call_operand.vmem [shape: f32[1,512], index: 3, kind: input, shape index: {}]   ;;  %s4002_s4 = inlined_call_operand.hbm [shape: bf16[8,8,128], index: 4, kind: output, shape index: {}]  }
   0x1   :  { %10 = vsyncpa [#allocation7], 0  ;;  %s3364_s15 = smov [#allocation5]  }
   0x2   :  { %s20_s16 = sshll.u32 %s3364_s15, 4  ;;  %s21_s16 = int_to_ptr.vmem [resolvable:$true] %s20_s16 }
   0x3   :  { %s3328_s17 = scalar_lea.vmem %s21_s16, 4096  ;;  %p3333_p1 = scmp.lt.s32.totalorder %s21_s16, %s21_s16 }
   0x4   :  { %p3329_p0 = scmp.ne.s32.totalorder %s21_s16, %s3328_s17  ;;  %p3334_p2 = scmp.lt.s32.totalorder %s3328_s17, %s3328_s17 }
   0x6   :  { %p3335_p3 = por %p3334_p2, %p3333_p1 }
   0x8   :  { %p3336_p4 = pnand %p3335_p3, %p3329_p0 }
   0xa   :  { %3339 = shalt.err (!%p3336_p4)
}
   0xb   :  { %s3365_s18 = smov 256   ;;  %s3366_s19 = smov 16  }
   0xc   :  { %26 = dma.hbm_to_vmem [thread:$0]  %s4000_s2, 4096, %s21_s16, [#allocation6], %s3365_s18, %s3365_s18, %s3366_s19  }
   0xd   :  { %3360 = dma.done.wait [#allocation6], 4096  }
   0xe   :  { %3361 = vsyncadd [#allocation6], 4294963200  ;;  %v54_v0 = vlaneseq  ;;  %v3367_v1 = vmov 1983009808   ;;  %v4003_v3 = vmov 0   ;;  %v51_v7 = vld [vmem:[%s3999_s1] sm:$0xff] }
   0xf   :  { %v77_v2 = vunpack.c.l.s4 %v3367_v1  ;;  %150 = vmatprep.mubr.bf16.mxu0 %v4003_v3  ;;  %223 = vmatprep.mubr.bf16.mxu1 %v4003_v3  ;;  %vm105_vm0 = vcmask 1041408   ;;  %v75_v9 = vcombine.high %v51_v7, %v51_v7  ;;  %v39_v10 = vld [vmem:[%s3998_s0] sm:$0xff]  ;;  %v40_v11 = vld [vmem:[%s3998_s0 + $0x8] sm:$0xff]  ;;  %vm92_vm1 = vcmask 31744   ;;  %v41_v25 = vld [vmem:[%s3998_s0 + $0x10] sm:$0xff] }
  0x10   :  { %v3403_v4 = vshrl.u32 %v54_v0, 7  ;;  %v3416_v15 = vld [vmem:[#allocation5 + $0xe4] ss:$16 sps:$4 sm:$0xff]   ;;  %v47_v18 = vpack.c.bf16 %v40_v11, %v39_v10  ;;  %v3420_v19 = vld [vmem:[#allocation5 + $0xec] ss:$16 sps:$4 sm:$0xff]   ;;  %v3369_v59 = vmov 0.0|0.0  }
  0x11   :  { %v78_v5 = vunpack.c.0.s8 %v77_v2  ;;  %v3422_v20 = vld [vmem:[#allocation5 + $0xe0] ss:$16 sps:$4 sm:$0xff]   ;;  %v3426_v21 = vld [vmem:[#allocation5 + $0xc4] ss:$16 sps:$4 sm:$0xff]   ;;  %v3428_v22 = vld [vmem:[#allocation5 + $0xe8] ss:$16 sps:$4 sm:$0xff]  }
  0x12   :  { %v3432_v23 = vld [vmem:[#allocation5 + $0xc0] ss:$16 sps:$4 sm:$0xff]   ;;  %v3434_v24 = vld [vmem:[#allocation5 + $0xcc] ss:$16 sps:$4 sm:$0xff]   ;;  %v3446_v27 = vld [vmem:[#allocation5 + $0xa4] ss:$16 sps:$4 sm:$0xff]  }
  0x13   :  { %v81_v6 = vsub.s32 %v78_v5, %v3403_v4  ;;  %v42_v26 = vld [vmem:[%s3998_s0 + $0x18] sm:$0xff]  ;;  %v3456_v31 = vld [vmem:[#allocation5 + $0xa0] ss:$16 sps:$4 sm:$0xff]   ;;  %v3459_v32 = vld [vmem:[#allocation5 + $0x84] ss:$16 sps:$4 sm:$0xff]   ;;  %v56_v60 = vsub.s32 0, %v3403_v4 }
  0x14   :  { %v3449_v28 = vld [vmem:[#allocation5 + $0xc8] ss:$16 sps:$4 sm:$0xff]   ;;  %v48_v29 = vpack.c.bf16 %v42_v26, %v41_v25  ;;  %v3453_v30 = vld [vmem:[#allocation5 + $0xac] ss:$16 sps:$4 sm:$0xff]   ;;  %v3469_v35 = vld [vmem:[#allocation5 + $0x80] ss:$16 sps:$4 sm:$0xff]  }
  0x15   :  { %v82_v8 = vrot.slane %v51_v7, %v81_v6  ;;  %v89_v14 = vrot.slane %v75_v9, %v81_v6  ;;  %v3462_v33 = vld [vmem:[#allocation5 + $0xa8] ss:$16 sps:$4 sm:$0xff]   ;;  %v3466_v34 = vld [vmem:[#allocation5 + $0x8c] ss:$16 sps:$4 sm:$0xff]   ;;  %v43_v36 = vld [vmem:[%s3998_s0 + $0x20] sm:$0xff]  ;;  %v64_v61 = vsub.s32 2, %v3403_v4 }
  0x16   :  { %v44_v37 = vld [vmem:[%s3998_s0 + $0x28] sm:$0xff]  ;;  %v3480_v38 = vld [vmem:[#allocation5 + $0x64] ss:$16 sps:$4 sm:$0xff]   ;;  %v3487_v41 = vld [vmem:[#allocation5 + $0x60] ss:$16 sps:$4 sm:$0xff]   ;;  %v60_v0 = vsub.s32 1, %v3403_v4 }
  0x17   :  { %v90_v12 = vcombine.high %v82_v8, %v82_v8  ;;  %v107_v13 = vsel %vm105_vm0, %v82_v8, 0  ;;  %v91_v16 = vcombine.high %v89_v14, %v89_v14  ;;  %v113_v17 = vsel %vm105_vm0, %v89_v14, 0  ;;  %v3483_v39 = vld [vmem:[#allocation5 + $0x88] ss:$16 sps:$4 sm:$0xff]   ;;  %v3489_v42 = vld [vmem:[#allocation5 + $0x6c] ss:$16 sps:$4 sm:$0xff]  }
  0x18   :  { %v49_v40 = vpack.c.bf16 %v44_v37, %v43_v36  ;;  %v3492_v43 = vld [vmem:[#allocation5 + $0x68] ss:$16 sps:$4 sm:$0xff]   ;;  %v3494_v44 = vld [vmem:[#allocation5 + $0x44] ss:$16 sps:$4 sm:$0xff]   ;;  %v3497_v45 = vld [vmem:[#allocation5 + $0x4c] ss:$16 sps:$4 sm:$0xff]  }
  0x19   :  { %2796 = vmatprep.subr.msk.bf16.mxu0 %vm105_vm0, %v90_v12  ;;  %2801 = vmatprep.subr.msk.bf16.mxu1 %vm105_vm0, %v91_v16  ;;  %v3500_v46 = vld [vmem:[#allocation5 + $0x40] ss:$16 sps:$4 sm:$0xff]   ;;  %v46_v48 = vld [vmem:[%s3998_s0 + $0x38] sm:$0xff]  ;;  %v3510_v49 = vld [vmem:[#allocation5 + $0x24] ss:$16 sps:$4 sm:$0xff]   ;;  %v68_v1 = vsub.s32 3, %v3403_v4 }
  0x1a   :  { %133 = vmatpush1.bf16.msra.mxu0 %v107_v13  ;;  %206 = vmatpush1.bf16.msra.mxu1 %v113_v17  ;;  %v45_v47 = vld [vmem:[%s3998_s0 + $0x30] sm:$0xff]  ;;  %v3513_v50 = vld [vmem:[#allocation5 + $0x48] ss:$16 sps:$4 sm:$0xff]   ;;  %v3518_v51 = vld [vmem:[#allocation5 + $0x2c] ss:$16 sps:$4 sm:$0xff]  }
  0x1b   :  { %495 = vmatprep.subr.bf16.mxu0 %v3416_v15  ;;  %536 = vmatprep.subr.bf16.mxu1 %v3420_v19  ;;  %v3521_v52 = vld [vmem:[#allocation5 + $0x20] ss:$16 sps:$4 sm:$0xff]   ;;  %v50_v53 = vpack.c.bf16 %v46_v48, %v45_v47  ;;  %v3525_v54 = vld [vmem:[#allocation5 + $0x4] ss:$16 sps:$4 sm:$0xff]   ;;  %v3528_v55 = vld [vmem:[#allocation5 + $0x28] ss:$16 sps:$4 sm:$0xff]  }
  0x1c   :  { %v3531_v56 = vld [vmem:[#allocation5 + $0xc] ss:$16 sps:$4 sm:$0xff]   ;;  %v3534_v57 = vld [vmem:[#allocation5] ss:$16 sps:$4 sm:$0xff]   ;;  %v3543_v58 = vld [vmem:[#allocation5 + $0x8] ss:$16 sps:$4 sm:$0xff]  }
  0x1d   :  { %2797 = vmatmul.mubr.msk.bf16.vlgmr.msra.gmra.mxu0 %vm92_vm1, %v47_v18  ;;  %2802 = vmatmul.mubr.msk.bf16.vlgmr.msra.gmra.mxu1 %vm92_vm1, %v47_v18  ;;  %v52_v62 = vld [vmem:[%s4001_s3] sm:$0xf]  ;;  %s3370_s3 = smov [#allocation8]  }
  0x1e   :  { %496 = vmatpush1.bf16.msra.mxu0 %v3422_v20  ;;  %160 = vmatprep.mubr.bf16.mxu0 %v4003_v3  ;;  %v57_v6 = vrot.slane %v52_v62, %v56_v60  ;;  %v3596_v7 = vrot.slane %v52_v62, %v64_v61  ;;  %v61_v10 = vrot.slane %v52_v62, %v60_v0  ;;  %s2784_s13 = sshll.u32 %s3370_s3, 4  ;;  %s2785_s13 = int_to_ptr.vmem [resolvable:$true] %s2784_s13 }
  0x1f   :  { %497 = vmatprep.subr.bf16.mxu0 %v3426_v21  ;;  %537 = vmatpush1.bf16.msra.mxu1 %v3428_v22  ;;  %v3602_v12 = vrot.slane %v52_v62, %v68_v1  ;;  %s3340_s14 = scalar_lea.vmem %s2785_s13, 512  ;;  %p3345_p6 = scmp.lt.s32.totalorder %s2785_s13, %s2785_s13 }
  0x20   :  { %233 = vmatprep.mubr.bf16.mxu1 %v4003_v3  ;;  %538 = vmatprep.subr.bf16.mxu1 %v3434_v24  ;;  %p3341_p5 = scmp.ne.s32.totalorder %s2785_s13, %s3340_s14  ;;  %p3346_p7 = scmp.lt.s32.totalorder %s3340_s14, %s3340_s14 }
  0x22   :  { %498 = vmatpush1.bf16.msra.mxu0 %v3432_v23  ;;  %p3347_p8 = por %p3346_p7, %p3345_p6 }
  0x23   :  { %499 = vmatprep.subr.bf16.mxu0 %v3446_v27  ;;  %539 = vmatpush1.bf16.msra.mxu1 %v3449_v28 }
  0x24   :  { %540 = vmatprep.subr.bf16.mxu1 %v3453_v30  ;;  %p3348_p9 = pnand %p3347_p8, %p3341_p5 }
  0x25   :  { %2798 = vmatmul.mubr.msk.bf16.gmra.mxu0 %vm92_vm1, %v48_v29  ;;  %2803 = vmatmul.mubr.msk.bf16.gmra.mxu1 %vm92_vm1, %v48_v29 }
  0x26   :  { %500 = vmatpush1.bf16.msra.mxu0 %v3456_v31  ;;  %170 = vmatprep.mubr.bf16.mxu0 %v4003_v3 }
  0x27   :  { %501 = vmatprep.subr.bf16.mxu0 %v3459_v32  ;;  %541 = vmatpush1.bf16.msra.mxu1 %v3462_v33 }
  0x28   :  { %243 = vmatprep.mubr.bf16.mxu1 %v4003_v3  ;;  %542 = vmatprep.subr.bf16.mxu1 %v3466_v34 }
  0x2a   :  { %502 = vmatpush1.bf16.msra.mxu0 %v3469_v35 }
  0x2b   :  { %503 = vmatprep.subr.bf16.mxu0 %v3480_v38  ;;  %543 = vmatpush1.bf16.msra.mxu1 %v3483_v39 }
  0x2c   :  { %544 = vmatprep.subr.bf16.mxu1 %v3489_v42 }
  0x2d   :  { %2799 = vmatmul.mubr.msk.bf16.gmra.mxu0 %vm92_vm1, %v49_v40  ;;  %2804 = vmatmul.mubr.msk.bf16.gmra.mxu1 %vm92_vm1, %v49_v40 }
  0x2e   :  { %504 = vmatpush1.bf16.msra.mxu0 %v3487_v41  ;;  %180 = vmatprep.mubr.bf16.mxu0 %v4003_v3 }
  0x2f   :  { %505 = vmatprep.subr.bf16.mxu0 %v3494_v44  ;;  %545 = vmatpush1.bf16.msra.mxu1 %v3492_v43 }
  0x30   :  { %253 = vmatprep.mubr.bf16.mxu1 %v4003_v3  ;;  %546 = vmatprep.subr.bf16.mxu1 %v3497_v45 }
  0x32   :  { %506 = vmatpush1.bf16.msra.mxu0 %v3500_v46 }
  0x33   :  { %507 = vmatprep.subr.bf16.mxu0 %v3510_v49  ;;  %547 = vmatpush1.bf16.msra.mxu1 %v3513_v50 }
  0x34   :  { %548 = vmatprep.subr.bf16.mxu1 %v3518_v51 }
  0x35   :  { %2800 = vmatmul.mubr.msk.bf16.gmra.mxu0 %vm92_vm1, %v50_v53  ;;  %2805 = vmatmul.mubr.msk.bf16.gmra.mxu1 %vm92_vm1, %v50_v53 }
  0x36   :  { %508 = vmatpush1.bf16.msra.mxu0 %v3521_v52  ;;  %527 = vmatprep.mubr.bf16.mxu0 %v4003_v3 }
  0x37   :  { %509 = vmatprep.subr.bf16.mxu0 %v3525_v54  ;;  %549 = vmatpush1.bf16.msra.mxu1 %v3528_v55 }
  0x38   :  { %568 = vmatprep.mubr.bf16.mxu1 %v4003_v3  ;;  %550 = vmatprep.subr.bf16.mxu1 %v3531_v56 }
  0x3a   :  { %510 = vmatpush1.bf16.msra.mxu0 %v3534_v57 }
  0x3b   :  { %804 = vmatprep.subr.bf16.mxu0 %v3416_v15  ;;  %551 = vmatpush1.bf16.msra.mxu1 %v3543_v58 }
  0x3c   :  { %845 = vmatprep.subr.bf16.mxu1 %v3420_v19 }
  0x3d   :  { %528 = vmatmul.mubr.bf16.vlgmr.msra.gmra.mxu0 %v3369_v59 }
  0x3e   :  { %805 = vmatpush1.bf16.msra.mxu0 %v3422_v20  ;;  %836 = vmatprep.mubr.bf16.mxu0 %v4003_v3 }
  0x3f   :  { %569 = vmatmul.mubr.bf16.vlgmr.msra.gmra.mxu1 %v3369_v59  ;;  %806 = vmatprep.subr.bf16.mxu0 %v3426_v21 }
  0x40   :  { %846 = vmatpush1.bf16.msra.mxu1 %v3428_v22  ;;  %877 = vmatprep.mubr.bf16.mxu1 %v4003_v3 }
  0x41   :  { %847 = vmatprep.subr.bf16.mxu1 %v3434_v24 }
  0x42   :  { %807 = vmatpush1.bf16.msra.mxu0 %v3432_v23 }
  0x43   :  { %808 = vmatprep.subr.bf16.mxu0 %v3446_v27 }
  0x44   :  { %848 = vmatpush1.bf16.msra.mxu1 %v3449_v28 }
  0x45   :  { %849 = vmatprep.subr.bf16.mxu1 %v3453_v30 }
  0x46   :  { %809 = vmatpush1.bf16.msra.mxu0 %v3456_v31 }
  0x47   :  { %810 = vmatprep.subr.bf16.mxu0 %v3459_v32 }
  0x48   :  { %850 = vmatpush1.bf16.msra.mxu1 %v3462_v33 }
  0x49   :  { %851 = vmatprep.subr.bf16.mxu1 %v3466_v34 }
  0x4a   :  { %811 = vmatpush1.bf16.msra.mxu0 %v3469_v35 }
  0x4b   :  { %812 = vmatprep.subr.bf16.mxu0 %v3480_v38 }
  0x4c   :  { %852 = vmatpush1.bf16.msra.mxu1 %v3483_v39 }
  0x4d   :  { %853 = vmatprep.subr.bf16.mxu1 %v3489_v42 }
  0x4e   :  { %813 = vmatpush1.bf16.msra.mxu0 %v3487_v41 }
  0x4f   :  { %814 = vmatprep.subr.bf16.mxu0 %v3494_v44 }
  0x50   :  { %854 = vmatpush1.bf16.msra.mxu1 %v3492_v43 }
  0x51   :  { %855 = vmatprep.subr.bf16.mxu1 %v3497_v45 }
  0x52   :  { %815 = vmatpush1.bf16.msra.mxu0 %v3500_v46 }
  0x53   :  { %816 = vmatprep.subr.bf16.mxu0 %v3510_v49 }
  0x54   :  { %856 = vmatpush1.bf16.msra.mxu1 %v3513_v50 }
  0x55   :  { %857 = vmatprep.subr.bf16.mxu1 %v3518_v51 }
  0x56   :  { %817 = vmatpush1.bf16.msra.mxu0 %v3521_v52 }
  0x57   :  { %818 = vmatprep.subr.bf16.mxu0 %v3525_v54 }
  0x58   :  { %858 = vmatpush1.bf16.msra.mxu1 %v3528_v55 }
  0x59   :  { %859 = vmatprep.subr.bf16.mxu1 %v3531_v56 }
  0x5a   :  { %819 = vmatpush1.bf16.msra.mxu0 %v3534_v57 }
  0x5b   :  { %1114 = vmatprep.subr.bf16.mxu0 %v3416_v15 }
  0x5c   :  { %860 = vmatpush1.bf16.msra.mxu1 %v3543_v58 }
  0x5d   :  { %1155 = vmatprep.subr.bf16.mxu1 %v3420_v19 }
  0xdd   :  { %v152_v63 = vpop.f32.mrf.mxu0  ;;  %v3594_v5 = vpop.f32.mrf.mxu1 }
  0xdf   :  { %v3592_v2 = vpop.f32.mrf.mxu0  ;;  %v3598_v9 = vpop.f32.mrf.mxu1 }
  0xe1   :  { %v156_v8 = vpop.f32.mrf.mxu0  ;;  %v229_v14 = vpop.f32.mrf.mxu1 }
  0xe2   :  { %v3600_v11 = vadd.f32 %v156_v8, %v57_v6  ;;  %v3607_v4 = vadd.f32 %v229_v14, %v3596_v7 }
  0xe3   :  { %v158_v13 = vpop.f32.mrf.mxu0  ;;  %v231_v18 = vpop.f32.mrf.mxu1 }
  0xe4   :  { %v3604_v16 = vadd.f32 %v158_v13, %v61_v10  ;;  %v3612_v26 = vadd.f32 %v231_v18, %v3602_v12 }
  0xe5   :  { %v162_v17 = vpop.f32.mrf.mxu0  ;;  %v235_v36 = vpop.f32.mrf.mxu1 }
  0xe6   :  { %v3609_v25 = vadd.f32 %v162_v17, %v57_v6  ;;  %v3617_v40 = vadd.f32 %v235_v36, %v3596_v7 }
  0xe7   :  { %v164_v29 = vpop.f32.mrf.mxu0  ;;  %v237_v48 = vpop.f32.mrf.mxu1 }
  0xe8   :  { %v3614_v37 = vadd.f32 %v164_v29, %v61_v10  ;;  %v3622_v59 = vadd.f32 %v237_v48, %v3602_v12 }
  0xe9   :  { %v166_v47 = vpop.f32.mrf.mxu0  ;;  %v239_v61 = vpop.f32.mrf.mxu1 }
  0xea   :  { %v3619_v53 = vadd.f32 %v166_v47, %v57_v6  ;;  %v3627_v0 = vadd.f32 %v239_v61, %v3596_v7 }
  0xeb   :  { %v168_v60 = vpop.f32.mrf.mxu0  ;;  %v241_v8 = vpop.f32.mrf.mxu1 }
  0xec   :  { %4005 = vst [vmem:[#allocation11_spill] sm:$0xff] %v3619_v53  ;;  %v3624_v62 = vadd.f32 %v168_v60, %v61_v10  ;;  %4007 = vst [vmem:[#allocation13_spill] sm:$0xff] %v3627_v0  ;;  %v3632_v14 = vadd.f32 %v241_v8, %v3602_v12 }
  0xed   :  { %v172_v1 = vpop.f32.mrf.mxu0  ;;  %v245_v18 = vpop.f32.mrf.mxu1 }
  0xee   :  { %4006 = vst [vmem:[#allocation12_spill] sm:$0xff] %v3624_v62  ;;  %v3629_v13 = vadd.f32 %v172_v1, %v57_v6  ;;  %4009 = vst [vmem:[#allocation15_spill] sm:$0xff] %v3632_v14  ;;  %v3637_v36 = vadd.f32 %v245_v18, %v3596_v7 }
  0xef   :  { %v174_v17 = vpop.f32.mrf.mxu0  ;;  %v247_v48 = vpop.f32.mrf.mxu1 }
  0xf0   :  { %4008 = vst [vmem:[#allocation14_spill] sm:$0xff] %v3629_v13  ;;  %v3634_v29 = vadd.f32 %v174_v17, %v61_v10  ;;  %4011 = vst [vmem:[#allocation17_spill] sm:$0xff] %v3637_v36  ;;  %v3642_v61 = vadd.f32 %v247_v48, %v3602_v12 }
  0xf1   :  { %v176_v47 = vpop.f32.mrf.mxu0  ;;  %v249_v1 = vpop.f32.mrf.mxu1 }
  0xf2   :  { %4010 = vst [vmem:[#allocation16_spill] sm:$0xff] %v3634_v29  ;;  %v3639_v60 = vadd.f32 %v176_v47, %v57_v6  ;;  %4013 = vst [vmem:[#allocation19_spill] sm:$0xff] %v3642_v61  ;;  %v3647_v8 = vadd.f32 %v249_v1, %v3596_v7 }
  0xf3   :  { %v178_v3 = vpop.f32.mrf.mxu0  ;;  %v251_v17 = vpop.f32.mrf.mxu1 }
  0xf4   :  { %4012 = vst [vmem:[#allocation18_spill] sm:$0xff] %v3639_v60  ;;  %v3644_v13 = vadd.f32 %v178_v3, %v61_v10  ;;  %4015 = vst [vmem:[#allocation21_spill] sm:$0xff] %v3647_v8  ;;  %v3652_v18 = vadd.f32 %v251_v17, %v3602_v12 }
  0xf5   :  { %v182_v14 = vpop.f32.mrf.mxu0  ;;  %v255_v47 = vpop.f32.mrf.mxu1 }
  0xf6   :  { %4014 = vst [vmem:[#allocation20_spill] sm:$0xff] %v3644_v13  ;;  %v3649_v29 = vadd.f32 %v182_v14, %v57_v6  ;;  %4017 = vst [vmem:[#allocation23_spill] sm:$0xff] %v3652_v18  ;;  %v3657_v48 = vadd.f32 %v255_v47, %v3596_v7  ;;  %v155_v47 = vadd.f32 %v3592_v2, %v61_v10 }
  0xf7   :  { %v184_v36 = vpop.f32.mrf.mxu0  ;;  %v257_v3 = vpop.f32.mrf.mxu1 }
  0xf8   :  { %4016 = vst [vmem:[#allocation22_spill] sm:$0xff] %v3649_v29  ;;  %v3654_v60 = vadd.f32 %v184_v36, %v61_v10  ;;  %4019 = vst [vmem:[#allocation25_spill] sm:$0xff] %v3657_v48  ;;  %v3662_v1 = vadd.f32 %v257_v3, %v3602_v12  ;;  %v153_v29 = vadd.f32 %v152_v63, %v57_v6 }
  0xf9   :  { %v186_v61 = vpop.f32.mrf.mxu0  ;;  %v259_v14 = vpop.f32.mrf.mxu1 }
  0xfa   :  { %4018 = vst [vmem:[#allocation24_spill] sm:$0xff] %v3654_v60  ;;  %v3659_v13 = vadd.f32 %v186_v61, %v57_v6  ;;  %4021 = vst [vmem:[#allocation27_spill] sm:$0xff] %v3662_v1  ;;  %v3667_v17 = vadd.f32 %v259_v14, %v3596_v7 }
  0xfb   :  { %v188_v8 = vpop.f32.mrf.mxu0  ;;  %v261_v36 = vpop.f32.mrf.mxu1 }
  0xfc   :  { %4020 = vst [vmem:[#allocation26_spill] sm:$0xff] %v3659_v13  ;;  %v3664_v0 = vadd.f32 %v188_v8, %v61_v10  ;;  %4022 = vst [vmem:[#allocation28_spill] sm:$0xff] %v3667_v17  ;;  %v3671_v48 = vadd.f32 %v261_v36, %v3602_v12  ;;  %v226_v17 = vadd.f32 %v3594_v5, %v3596_v7 }
  0xfd   :  { %v529_v60 = vpop.f32.mrf.mxu0  ;;  %v228_v10 = vadd.f32 %v3598_v9, %v3602_v12 }
  0xfe   :  { %v577_v61 = vadd.f32 %v529_v60, %v153_v29 }
  0xff   :  { %v531_v13 = vpop.f32.mrf.mxu0  ;;  %v570_v18 = vpop.f32.mrf.mxu1 }
 0x100   :  { %v2838_v3 = vmul.f32 -1.442695, %v577_v61  ;;  %v578_v1 = vadd.f32 %v531_v13, %v155_v47  ;;  %v579_v2 = vadd.f32 %v570_v18, %v226_v17 }
 0x101   :  { %v533_v62 = vpop.f32.mrf.mxu0  ;;  %v572_v53 = vpop.f32.mrf.mxu1 }
 0x102   :  { %3192 = vpow2.f32 %v2838_v3  ;;  %v2839_v63 = vmul.f32 -1.442695, %v578_v1  ;;  %v2840_v29 = vmul.f32 -1.442695, %v579_v2  ;;  %v580_v36 = vadd.f32 %v572_v53, %v228_v10 }
 0x103   :  { %v534_v6 = vpop.f32.mrf.mxu0  ;;  %v574_v8 = vpop.f32.mrf.mxu1 }
 0x104   :  { %3194 = vpow2.f32 %v2839_v63  ;;  %v4023_v8 = vmov 0  }
 0x105   :  { %v575_v14 = vpop.f32.mrf.mxu1  ;;  %3196 = vpow2.f32 %v2840_v29 }
 0x10f   :  { %v3193_v60 = vpop.eup %3192 }
 0x110   :  { %v590_v61 = vadd.f32 1.0, %v3193_v60 }
 0x111   :  { %v3195_v13 = vpop.eup %3194 }
 0x112   :  { %3198 = vrcp.f32 %v590_v61  ;;  %v591_v62 = vadd.f32 1.0, %v3195_v13  ;;  %v3197_v1 = vpop.eup %3196 }
 0x113   :  { %3200 = vtanh.f32 %v580_v36  ;;  %v592_v6 = vadd.f32 1.0, %v3197_v1 }
 0x114   :  { %3202 = vrcp.f32 %v591_v62 }
 0x115   :  { %3204 = vrcp.f32 %v592_v6 }
 0x11f   :  { %v3199_v47 = vpop.eup %3198 }
 0x120   :  { %v3201_v3 = vpop.eup %3200 }
 0x121   :  { %v3203_v63 = vpop.eup %3202  ;;  %v601_v7 = vmul.f32 %v3201_v3, %v3199_v47 }
 0x122   :  { %v600_v5 = vmul.f32 0.0, %v3203_v63  ;;  %v3205_v9 = vpop.eup %3204 }
 0x124   :  { %v3677_v18 = vadd.f32 %v601_v7, %v600_v5 }
 0x126   :  { %3206 = vtanh.f32 %v3677_v18 }
 0x133   :  { %v3207_v12 = vpop.eup %3206 }
 0x134   :  { %v604_v53 = vmul.f32 %v3207_v12, %v3205_v9 }
 0x136   :  { %v605_v17 = vpack.c.bf16 %v604_v53, %v604_v53 }
 0x138   :  { %606 = vst [vmem:[#allocation8] sm:$0xf] %v605_v17  ;;  %837 = vmatmul.mubr.bf16.vlgmr.msra.gmra.mxu0 %v605_v17  ;;  %878 = vmatmul.mubr.bf16.vlgmr.msra.gmra.mxu1 %v605_v17 }
 0x139   :  { %1115 = vmatpush1.bf16.msra.mxu0 %v3422_v20  ;;  %1156 = vmatpush1.bf16.msra.mxu1 %v3428_v22 }
 0x13a   :  { %1116 = vmatprep.subr.bf16.mxu0 %v3426_v21  ;;  %1157 = vmatprep.subr.bf16.mxu1 %v3434_v24 }
 0x13b   :  { %1146 = vmatprep.mubr.bf16.mxu0 %v4023_v8  ;;  %1187 = vmatprep.mubr.bf16.mxu1 %v4023_v8 }
 0x13d   :  { %1117 = vmatpush1.bf16.msra.mxu0 %v3432_v23  ;;  %1158 = vmatpush1.bf16.msra.mxu1 %v3449_v28 }
 0x13e   :  { %1118 = vmatprep.subr.bf16.mxu0 %v3446_v27  ;;  %1159 = vmatprep.subr.bf16.mxu1 %v3453_v30 }
 0x141   :  { %1119 = vmatpush1.bf16.msra.mxu0 %v3456_v31  ;;  %1160 = vmatpush1.bf16.msra.mxu1 %v3462_v33 }
 0x142   :  { %1120 = vmatprep.subr.bf16.mxu0 %v3459_v32  ;;  %1161 = vmatprep.subr.bf16.mxu1 %v3466_v34 }
 0x145   :  { %1121 = vmatpush1.bf16.msra.mxu0 %v3469_v35  ;;  %1162 = vmatpush1.bf16.msra.mxu1 %v3483_v39 }
 0x146   :  { %1122 = vmatprep.subr.bf16.mxu0 %v3480_v38  ;;  %1163 = vmatprep.subr.bf16.mxu1 %v3489_v42 }
 0x149   :  { %1123 = vmatpush1.bf16.msra.mxu0 %v3487_v41  ;;  %1164 = vmatpush1.bf16.msra.mxu1 %v3492_v43 }
 0x14a   :  { %1124 = vmatprep.subr.bf16.mxu0 %v3494_v44  ;;  %1165 = vmatprep.subr.bf16.mxu1 %v3497_v45 }
 0x14d   :  { %1125 = vmatpush1.bf16.msra.mxu0 %v3500_v46  ;;  %1166 = vmatpush1.bf16.msra.mxu1 %v3513_v50 }
 0x14e   :  { %1126 = vmatprep.subr.bf16.mxu0 %v3510_v49  ;;  %1167 = vmatprep.subr.bf16.mxu1 %v3518_v51 }
 0x151   :  { %1127 = vmatpush1.bf16.msra.mxu0 %v3521_v52  ;;  %1168 = vmatpush1.bf16.msra.mxu1 %v3528_v55 }
 0x152   :  { %1128 = vmatprep.subr.bf16.mxu0 %v3525_v54  ;;  %1169 = vmatprep.subr.bf16.mxu1 %v3531_v56 }
 0x155   :  { %1129 = vmatpush1.bf16.msra.mxu0 %v3534_v57  ;;  %1170 = vmatpush1.bf16.msra.mxu1 %v3543_v58 }
 0x156   :  { %1424 = vmatprep.subr.bf16.mxu0 %v3416_v15  ;;  %1465 = vmatprep.subr.bf16.mxu1 %v3420_v19 }
 0x1f8   :  { %v838_v14 = vpop.f32.mrf.mxu0  ;;  %v879_v2 = vpop.f32.mrf.mxu1 }
 0x1f9   :  { %v886_v10 = vadd.f32 %v838_v14, %v3600_v11  ;;  %v888_v15 = vadd.f32 %v879_v2, %v3607_v4 }
 0x1fa   :  { %v840_v29 = vpop.f32.mrf.mxu0  ;;  %v881_v60 = vpop.f32.mrf.mxu1 }
 0x1fb   :  { %v2873_v36 = vmul.f32 -1.442695, %v886_v10  ;;  %v887_v61 = vadd.f32 %v840_v29, %v3604_v16  ;;  %v2875_v63 = vmul.f32 -1.442695, %v888_v15  ;;  %v889_v19 = vadd.f32 %v881_v60, %v3612_v26  ;;  %v3794_v15 = vld [vmem:[#allocation5 + $0xa8] ss:$16 sps:$4 sm:$0xff]  }
 0x1fc   :  { %v842_v13 = vpop.f32.mrf.mxu0  ;;  %v883_v62 = vpop.f32.mrf.mxu1 }
 0x1fd   :  { %3208 = vpow2.f32 %v2873_v36  ;;  %v2874_v1 = vmul.f32 -1.442695, %v887_v61  ;;  %v3776_v36 = vld [vmem:[#allocation5 + $0xc4] ss:$16 sps:$4 sm:$0xff]   ;;  %v3778_v61 = vld [vmem:[#allocation5 + $0xcc] ss:$16 sps:$4 sm:$0xff]  }
 0x1fe   :  { %v843_v47 = vpop.f32.mrf.mxu0  ;;  %v884_v3 = vpop.f32.mrf.mxu1  ;;  %v3780_v13 = vld [vmem:[#allocation5 + $0xc0] ss:$16 sps:$4 sm:$0xff]   ;;  %v3782_v62 = vld [vmem:[#allocation5 + $0xc8] ss:$16 sps:$4 sm:$0xff]  }
 0x1ff   :  { %3210 = vpow2.f32 %v2874_v1  ;;  %v3788_v1 = vld [vmem:[#allocation5 + $0xa4] ss:$16 sps:$4 sm:$0xff]   ;;  %v3790_v47 = vld [vmem:[#allocation5 + $0xac] ss:$16 sps:$4 sm:$0xff]   ;;  %v3792_v3 = vld [vmem:[#allocation5 + $0xa0] ss:$16 sps:$4 sm:$0xff]  }
 0x200   :  { %3212 = vpow2.f32 %v2875_v63  ;;  %v3800_v63 = vld [vmem:[#allocation5 + $0x84] ss:$16 sps:$4 sm:$0xff]  }
 0x201   :  { %3214 = vtanh.f32 %v889_v19  ;;  %v3802_v19 = vld [vmem:[#allocation5 + $0x8c] ss:$16 sps:$4 sm:$0xff]  }
 0x20a   :  { %v3209_v6 = vpop.eup %3208 }
 0x20b   :  { %v899_v5 = vadd.f32 1.0, %v3209_v6  ;;  %v3804_v6 = vld [vmem:[#allocation5 + $0x80] ss:$16 sps:$4 sm:$0xff]  }
 0x20c   :  { %v3211_v11 = vpop.eup %3210 }
 0x20d   :  { %3216 = vrcp.f32 %v899_v5  ;;  %v900_v7 = vadd.f32 1.0, %v3211_v11  ;;  %v3213_v16 = vpop.eup %3212  ;;  %v3806_v5 = vld [vmem:[#allocation5 + $0x88] ss:$16 sps:$4 sm:$0xff]   ;;  %v3810_v11 = vld [vmem:[#allocation5 + $0x64] ss:$16 sps:$4 sm:$0xff]  }
 0x20e   :  { %v3215_v9 = vpop.eup %3214  ;;  %v901_v14 = vadd.f32 1.0, %v3213_v16  ;;  %v3816_v16 = vld [vmem:[#allocation5 + $0x60] ss:$16 sps:$4 sm:$0xff]  }
 0x20f   :  { %3218 = vrcp.f32 %v900_v7  ;;  %v3812_v7 = vld [vmem:[#allocation5 + $0x6c] ss:$16 sps:$4 sm:$0xff]  }
 0x210   :  { %3220 = vrcp.f32 %v901_v14  ;;  %v3830_v14 = vld [vmem:[#allocation5 + $0x48] ss:$16 sps:$4 sm:$0xff]  }
 0x21a   :  { %v3217_v12 = vpop.eup %3216 }
 0x21b   :  { %v910_v53 = vmul.f32 %v3217_v12, %v3215_v9  ;;  %v3818_v9 = vld [vmem:[#allocation5 + $0x68] ss:$16 sps:$4 sm:$0xff]   ;;  %v3822_v12 = vld [vmem:[#allocation5 + $0x44] ss:$16 sps:$4 sm:$0xff]  }
 0x21c   :  { %v3219_v17 = vpop.eup %3218 }
 0x21d   :  { %v909_v10 = vmul.f32 %v3219_v17, %v3677_v18  ;;  %v3221_v26 = vpop.eup %3220  ;;  %v3770_v18 = vld [vmem:[#allocation5 + $0xe8] ss:$16 sps:$4 sm:$0xff]   ;;  %v3828_v17 = vld [vmem:[#allocation5 + $0x40] ss:$16 sps:$4 sm:$0xff]  }
 0x21f   :  { %v3719_v4 = vadd.f32 %v910_v53, %v909_v10  ;;  %v3824_v53 = vld [vmem:[#allocation5 + $0x4c] ss:$16 sps:$4 sm:$0xff]   ;;  %v3834_v10 = vld [vmem:[#allocation5 + $0x24] ss:$16 sps:$4 sm:$0xff]  }
 0x221   :  { %3222 = vtanh.f32 %v3719_v4 }
 0x22e   :  { %v3223_v2 = vpop.eup %3222 }
 0x22f   :  { %v913_v29 = vmul.f32 %v3223_v2, %v3221_v26  ;;  %v3840_v26 = vld [vmem:[#allocation5 + $0x20] ss:$16 sps:$4 sm:$0xff]   ;;  %v3842_v2 = vld [vmem:[#allocation5 + $0x28] ss:$16 sps:$4 sm:$0xff]  }
 0x231   :  { %v914_v60 = vpack.c.bf16 %v913_v29, %v913_v29  ;;  %v3846_v29 = vld [vmem:[#allocation5 + $0x4] ss:$16 sps:$4 sm:$0xff]  }
 0x233   :  { %916 = vst [vmem:[#allocation8 + $0x4] sm:$0xf] %v914_v60  ;;  %1147 = vmatmul.mubr.bf16.vlgmr.msra.gmra.mxu0 %v914_v60  ;;  %1188 = vmatmul.mubr.bf16.vlgmr.msra.gmra.mxu1 %v914_v60  ;;  %v3848_v60 = vld [vmem:[#allocation5 + $0xc] ss:$16 sps:$4 sm:$0xff]  }
 0x234   :  { %1425 = vmatpush1.bf16.msra.mxu0 %v3422_v20  ;;  %1466 = vmatpush1.bf16.msra.mxu1 %v3428_v22 }
 0x235   :  { %1426 = vmatprep.subr.bf16.mxu0 %v3426_v21  ;;  %1467 = vmatprep.subr.bf16.mxu1 %v3434_v24 }
 0x236   :  { %1456 = vmatprep.mubr.bf16.mxu0 %v4023_v8  ;;  %1497 = vmatprep.mubr.bf16.mxu1 %v4023_v8 }
 0x238   :  { %1427 = vmatpush1.bf16.msra.mxu0 %v3432_v23  ;;  %1468 = vmatpush1.bf16.msra.mxu1 %v3449_v28 }
 0x239   :  { %1428 = vmatprep.subr.bf16.mxu0 %v3446_v27  ;;  %1469 = vmatprep.subr.bf16.mxu1 %v3453_v30 }
 0x23c   :  { %1429 = vmatpush1.bf16.msra.mxu0 %v3456_v31  ;;  %1470 = vmatpush1.bf16.msra.mxu1 %v3462_v33 }
 0x23d   :  { %1430 = vmatprep.subr.bf16.mxu0 %v3459_v32  ;;  %1471 = vmatprep.subr.bf16.mxu1 %v3466_v34 }
 0x240   :  { %1431 = vmatpush1.bf16.msra.mxu0 %v3469_v35  ;;  %1472 = vmatpush1.bf16.msra.mxu1 %v3483_v39 }
 0x241   :  { %1432 = vmatprep.subr.bf16.mxu0 %v3480_v38  ;;  %1473 = vmatprep.subr.bf16.mxu1 %v3489_v42 }
 0x244   :  { %1433 = vmatpush1.bf16.msra.mxu0 %v3487_v41  ;;  %1474 = vmatpush1.bf16.msra.mxu1 %v3492_v43 }
 0x245   :  { %1434 = vmatprep.subr.bf16.mxu0 %v3494_v44  ;;  %1475 = vmatprep.subr.bf16.mxu1 %v3497_v45 }
 0x248   :  { %1435 = vmatpush1.bf16.msra.mxu0 %v3500_v46  ;;  %1476 = vmatpush1.bf16.msra.mxu1 %v3513_v50 }
 0x249   :  { %1436 = vmatprep.subr.bf16.mxu0 %v3510_v49  ;;  %1477 = vmatprep.subr.bf16.mxu1 %v3518_v51 }
 0x24c   :  { %1437 = vmatpush1.bf16.msra.mxu0 %v3521_v52  ;;  %1478 = vmatpush1.bf16.msra.mxu1 %v3528_v55 }
 0x24d   :  { %1438 = vmatprep.subr.bf16.mxu0 %v3525_v54  ;;  %1479 = vmatprep.subr.bf16.mxu1 %v3531_v56 }
 0x250   :  { %1439 = vmatpush1.bf16.msra.mxu0 %v3534_v57  ;;  %1480 = vmatpush1.bf16.msra.mxu1 %v3543_v58 }
 0x2f3   :  { %v1148_v20 = vpop.f32.mrf.mxu0  ;;  %v1189_v21 = vpop.f32.mrf.mxu1 }
 0x2f4   :  { %v1196_v22 = vadd.f32 %v1148_v20, %v3609_v25  ;;  %v1198_v35 = vadd.f32 %v1189_v21, %v3617_v40  ;;  %v3766_v40 = vld [vmem:[#allocation5 + $0xec] ss:$16 sps:$4 sm:$0xff]   ;;  %v3852_v20 = vld [vmem:[#allocation5] ss:$16 sps:$4 sm:$0xff]   ;;  %v3854_v21 = vld [vmem:[#allocation5 + $0x8] ss:$16 sps:$4 sm:$0xff]  }
 0x2f5   :  { %v1150_v23 = vpop.f32.mrf.mxu0  ;;  %v1191_v24 = vpop.f32.mrf.mxu1  ;;  %1775 = vmatprep.subr.bf16.mxu1 %v3766_v40 }
 0x2f6   :  { %v2908_v27 = vmul.f32 -1.442695, %v1196_v22  ;;  %v1197_v28 = vadd.f32 %v1150_v23, %v3614_v37  ;;  %v2910_v38 = vmul.f32 -1.442695, %v1198_v35  ;;  %v1199_v39 = vadd.f32 %v1191_v24, %v3622_v59  ;;  %v3764_v37 = vld [vmem:[#allocation5 + $0xe4] ss:$16 sps:$4 sm:$0xff]  }
 0x2f7   :  { %v1152_v30 = vpop.f32.mrf.mxu0  ;;  %v1193_v31 = vpop.f32.mrf.mxu1  ;;  %v3768_v59 = vld [vmem:[#allocation5 + $0xe0] ss:$16 sps:$4 sm:$0xff]   ;;  %1734 = vmatprep.subr.bf16.mxu0 %v3764_v37 }
 0x2f8   :  { %3224 = vpow2.f32 %v2908_v27  ;;  %v2909_v32 = vmul.f32 -1.442695, %v1197_v28  ;;  %v4024_v24 = vld [vmem:[#allocation11_spill] sm:$0xff] }
 0x2f9   :  { %v1153_v33 = vpop.f32.mrf.mxu0  ;;  %v1194_v34 = vpop.f32.mrf.mxu1 }
 0x2fa   :  { %3226 = vpow2.f32 %v2909_v32  ;;  %v4025_v32 = vld [vmem:[#allocation12_spill] sm:$0xff] }
 0x2fb   :  { %3228 = vpow2.f32 %v2910_v38 }
 0x2fc   :  { %3230 = vtanh.f32 %v1199_v39 }
 0x305   :  { %v3225_v41 = vpop.eup %3224 }
 0x306   :  { %v1209_v42 = vadd.f32 1.0, %v3225_v41 }
 0x307   :  { %v3227_v43 = vpop.eup %3226 }
 0x308   :  { %3232 = vrcp.f32 %v1209_v42  ;;  %v1210_v44 = vadd.f32 1.0, %v3227_v43  ;;  %v3229_v45 = vpop.eup %3228  ;;  %v4026_v42 = vld [vmem:[#allocation13_spill] sm:$0xff] }
 0x309   :  { %v3231_v46 = vpop.eup %3230  ;;  %v1211_v52 = vadd.f32 1.0, %v3229_v45  ;;  %v4027_v45 = vld [vmem:[#allocation15_spill] sm:$0xff] }
 0x30a   :  { %3234 = vrcp.f32 %v1210_v44 }
 0x30b   :  { %3236 = vrcp.f32 %v1211_v52 }
 0x315   :  { %v3233_v49 = vpop.eup %3232 }
 0x316   :  { %v1220_v50 = vmul.f32 %v3233_v49, %v3231_v46 }
 0x317   :  { %v3235_v51 = vpop.eup %3234 }
 0x318   :  { %v1219_v54 = vmul.f32 %v3235_v51, %v3719_v4  ;;  %v3237_v56 = vpop.eup %3236  ;;  %v3836_v4 = vld [vmem:[#allocation5 + $0x2c] ss:$16 sps:$4 sm:$0xff]  }
 0x31a   :  { %v3759_v55 = vadd.f32 %v1220_v50, %v1219_v54 }
 0x31c   :  { %3238 = vtanh.f32 %v3759_v55 }
 0x329   :  { %v3239_v57 = vpop.eup %3238 }
 0x32a   :  { %v1223_v58 = vmul.f32 %v3239_v57, %v3237_v56 }
 0x32c   :  { %v1224_v25 = vpack.c.bf16 %v1223_v58, %v1223_v58 }
 0x32e   :  { %1226 = vst [vmem:[#allocation8 + $0x8] sm:$0xf] %v1224_v25  ;;  %1457 = vmatmul.mubr.bf16.vlgmr.msra.gmra.mxu0 %v1224_v25  ;;  %1498 = vmatmul.mubr.bf16.vlgmr.msra.gmra.mxu1 %v1224_v25 }
 0x32f   :  { %1766 = vmatprep.mubr.bf16.mxu0 %v4023_v8  ;;  %1807 = vmatprep.mubr.bf16.mxu1 %v4023_v8 }
 0x330   :  { %1735 = vmatpush1.bf16.msra.mxu0 %v3768_v59  ;;  %1776 = vmatpush1.bf16.msra.mxu1 %v3770_v18 }
 0x331   :  { %1736 = vmatprep.subr.bf16.mxu0 %v3776_v36  ;;  %1777 = vmatprep.subr.bf16.mxu1 %v3778_v61 }
 0x334   :  { %1737 = vmatpush1.bf16.msra.mxu0 %v3780_v13  ;;  %1778 = vmatpush1.bf16.msra.mxu1 %v3782_v62 }
 0x335   :  { %1738 = vmatprep.subr.bf16.mxu0 %v3788_v1  ;;  %1779 = vmatprep.subr.bf16.mxu1 %v3790_v47 }
 0x338   :  { %1739 = vmatpush1.bf16.msra.mxu0 %v3792_v3  ;;  %1780 = vmatpush1.bf16.msra.mxu1 %v3794_v15 }
 0x339   :  { %1740 = vmatprep.subr.bf16.mxu0 %v3800_v63  ;;  %1781 = vmatprep.subr.bf16.mxu1 %v3802_v19 }
 0x33c   :  { %1741 = vmatpush1.bf16.msra.mxu0 %v3804_v6  ;;  %1782 = vmatpush1.bf16.msra.mxu1 %v3806_v5 }
 0x33d   :  { %1742 = vmatprep.subr.bf16.mxu0 %v3810_v11  ;;  %1783 = vmatprep.subr.bf16.mxu1 %v3812_v7 }
 0x340   :  { %1743 = vmatpush1.bf16.msra.mxu0 %v3816_v16  ;;  %1784 = vmatpush1.bf16.msra.mxu1 %v3818_v9 }
 0x341   :  { %1744 = vmatprep.subr.bf16.mxu0 %v3822_v12  ;;  %1785 = vmatprep.subr.bf16.mxu1 %v3824_v53 }
 0x344   :  { %1745 = vmatpush1.bf16.msra.mxu0 %v3828_v17  ;;  %1786 = vmatpush1.bf16.msra.mxu1 %v3830_v14 }
 0x345   :  { %1746 = vmatprep.subr.bf16.mxu0 %v3834_v10  ;;  %1787 = vmatprep.subr.bf16.mxu1 %v3836_v4 }
 0x348   :  { %1747 = vmatpush1.bf16.msra.mxu0 %v3840_v26  ;;  %1788 = vmatpush1.bf16.msra.mxu1 %v3842_v2 }
 0x349   :  { %1748 = vmatprep.subr.bf16.mxu0 %v3846_v29  ;;  %1789 = vmatprep.subr.bf16.mxu1 %v3848_v60 }
 0x34c   :  { %1749 = vmatpush1.bf16.msra.mxu0 %v3852_v20  ;;  %1790 = vmatpush1.bf16.msra.mxu1 %v3854_v21 }
 0x34d   :  { %2044 = vmatprep.subr.bf16.mxu0 %v3764_v37  ;;  %2085 = vmatprep.subr.bf16.mxu1 %v3766_v40 }
 0x3ee   :  { %v1458_v22 = vpop.f32.mrf.mxu0  ;;  %v1499_v23 = vpop.f32.mrf.mxu1 }
 0x3ef   :  { %v1506_v27 = vadd.f32 %v1458_v22, %v4024_v24  ;;  %v1508_v43 = vadd.f32 %v1499_v23, %v4026_v42 }
 0x3f0   :  { %v1460_v28 = vpop.f32.mrf.mxu0  ;;  %v1501_v30 = vpop.f32.mrf.mxu1 }
 0x3f1   :  { %v2943_v31 = vmul.f32 -1.442695, %v1506_v27  ;;  %v1507_v33 = vadd.f32 %v1460_v28, %v4025_v32  ;;  %v2945_v44 = vmul.f32 -1.442695, %v1508_v43  ;;  %v1509_v46 = vadd.f32 %v1501_v30, %v4027_v45 }
 0x3f2   :  { %v1462_v34 = vpop.f32.mrf.mxu0  ;;  %v1503_v35 = vpop.f32.mrf.mxu1 }
 0x3f3   :  { %3240 = vpow2.f32 %v2943_v31  ;;  %v2944_v38 = vmul.f32 -1.442695, %v1507_v33  ;;  %v4028_v33 = vld [vmem:[#allocation14_spill] sm:$0xff] }
 0x3f4   :  { %v1463_v39 = vpop.f32.mrf.mxu0  ;;  %v1504_v41 = vpop.f32.mrf.mxu1 }
 0x3f5   :  { %3242 = vpow2.f32 %v2944_v38  ;;  %v4029_v41 = vld [vmem:[#allocation16_spill] sm:$0xff] }
 0x3f6   :  { %3244 = vpow2.f32 %v2945_v44 }
 0x3f7   :  { %3246 = vtanh.f32 %v1509_v46 }
 0x400   :  { %v3241_v49 = vpop.eup %3240 }
 0x401   :  { %v1519_v50 = vadd.f32 1.0, %v3241_v49 }
 0x402   :  { %v3243_v51 = vpop.eup %3242 }
 0x403   :  { %3248 = vrcp.f32 %v1519_v50  ;;  %v1520_v52 = vadd.f32 1.0, %v3243_v51  ;;  %v3245_v54 = vpop.eup %3244  ;;  %v4030_v50 = vld [vmem:[#allocation17_spill] sm:$0xff] }
 0x404   :  { %v3247_v56 = vpop.eup %3246  ;;  %v1521_v22 = vadd.f32 1.0, %v3245_v54  ;;  %v4031_v54 = vld [vmem:[#allocation19_spill] sm:$0xff] }
 0x405   :  { %3250 = vrcp.f32 %v1520_v52 }
 0x406   :  { %3252 = vrcp.f32 %v1521_v22 }
 0x410   :  { %v3249_v57 = vpop.eup %3248 }
 0x411   :  { %v1530_v58 = vmul.f32 %v3249_v57, %v3247_v56 }
 0x412   :  { %v3251_v25 = vpop.eup %3250 }
 0x413   :  { %v1529_v24 = vmul.f32 %v3251_v25, %v3759_v55  ;;  %v3253_v27 = vpop.eup %3252 }
 0x415   :  { %v3867_v23 = vadd.f32 %v1530_v58, %v1529_v24 }
 0x417   :  { %3254 = vtanh.f32 %v3867_v23 }
 0x424   :  { %v3255_v28 = vpop.eup %3254 }
 0x425   :  { %v1533_v30 = vmul.f32 %v3255_v28, %v3253_v27 }
 0x427   :  { %v1534_v31 = vpack.c.bf16 %v1533_v30, %v1533_v30 }
 0x429   :  { %1536 = vst [vmem:[#allocation8 + $0xc] sm:$0xf] %v1534_v31  ;;  %1767 = vmatmul.mubr.bf16.vlgmr.msra.gmra.mxu0 %v1534_v31  ;;  %1808 = vmatmul.mubr.bf16.vlgmr.msra.gmra.mxu1 %v1534_v31 }
 0x42a   :  { %2045 = vmatpush1.bf16.msra.mxu0 %v3768_v59  ;;  %2086 = vmatpush1.bf16.msra.mxu1 %v3770_v18 }
 0x42b   :  { %2046 = vmatprep.subr.bf16.mxu0 %v3776_v36  ;;  %2087 = vmatprep.subr.bf16.mxu1 %v3778_v61 }
 0x42c   :  { %2076 = vmatprep.mubr.bf16.mxu0 %v4023_v8  ;;  %2117 = vmatprep.mubr.bf16.mxu1 %v4023_v8 }
 0x42e   :  { %2047 = vmatpush1.bf16.msra.mxu0 %v3780_v13  ;;  %2088 = vmatpush1.bf16.msra.mxu1 %v3782_v62 }
 0x42f   :  { %2048 = vmatprep.subr.bf16.mxu0 %v3788_v1  ;;  %2089 = vmatprep.subr.bf16.mxu1 %v3790_v47 }
 0x432   :  { %2049 = vmatpush1.bf16.msra.mxu0 %v3792_v3  ;;  %2090 = vmatpush1.bf16.msra.mxu1 %v3794_v15 }
 0x433   :  { %2050 = vmatprep.subr.bf16.mxu0 %v3800_v63  ;;  %2091 = vmatprep.subr.bf16.mxu1 %v3802_v19 }
 0x436   :  { %2051 = vmatpush1.bf16.msra.mxu0 %v3804_v6  ;;  %2092 = vmatpush1.bf16.msra.mxu1 %v3806_v5 }
 0x437   :  { %2052 = vmatprep.subr.bf16.mxu0 %v3810_v11  ;;  %2093 = vmatprep.subr.bf16.mxu1 %v3812_v7 }
 0x43a   :  { %2053 = vmatpush1.bf16.msra.mxu0 %v3816_v16  ;;  %2094 = vmatpush1.bf16.msra.mxu1 %v3818_v9 }
 0x43b   :  { %2054 = vmatprep.subr.bf16.mxu0 %v3822_v12  ;;  %2095 = vmatprep.subr.bf16.mxu1 %v3824_v53 }
 0x43e   :  { %2055 = vmatpush1.bf16.msra.mxu0 %v3828_v17  ;;  %2096 = vmatpush1.bf16.msra.mxu1 %v3830_v14 }
 0x43f   :  { %2056 = vmatprep.subr.bf16.mxu0 %v3834_v10  ;;  %2097 = vmatprep.subr.bf16.mxu1 %v3836_v4 }
 0x442   :  { %2057 = vmatpush1.bf16.msra.mxu0 %v3840_v26  ;;  %2098 = vmatpush1.bf16.msra.mxu1 %v3842_v2 }
 0x443   :  { %2058 = vmatprep.subr.bf16.mxu0 %v3846_v29  ;;  %2099 = vmatprep.subr.bf16.mxu1 %v3848_v60 }
 0x446   :  { %2059 = vmatpush1.bf16.msra.mxu0 %v3852_v20  ;;  %2100 = vmatpush1.bf16.msra.mxu1 %v3854_v21 }
 0x447   :  { %2354 = vmatprep.subr.bf16.mxu0 %v3764_v37  ;;  %2395 = vmatprep.subr.bf16.mxu1 %v3766_v40 }
 0x4e9   :  { %v1768_v55 = vpop.f32.mrf.mxu0  ;;  %v1809_v32 = vpop.f32.mrf.mxu1 }
 0x4ea   :  { %v1816_v34 = vadd.f32 %v1768_v55, %v4028_v33  ;;  %v1818_v51 = vadd.f32 %v1809_v32, %v4030_v50 }
 0x4eb   :  { %v1770_v35 = vpop.f32.mrf.mxu0  ;;  %v1811_v38 = vpop.f32.mrf.mxu1 }
 0x4ec   :  { %v2978_v39 = vmul.f32 -1.442695, %v1816_v34  ;;  %v1817_v42 = vadd.f32 %v1770_v35, %v4029_v41  ;;  %v2980_v52 = vmul.f32 -1.442695, %v1818_v51  ;;  %v1819_v56 = vadd.f32 %v1811_v38, %v4031_v54 }
 0x4ed   :  { %v1772_v43 = vpop.f32.mrf.mxu0  ;;  %v1813_v44 = vpop.f32.mrf.mxu1 }
 0x4ee   :  { %3256 = vpow2.f32 %v2978_v39  ;;  %v2979_v45 = vmul.f32 -1.442695, %v1817_v42  ;;  %v4032_v42 = vld [vmem:[#allocation18_spill] sm:$0xff] }
 0x4ef   :  { %v1773_v46 = vpop.f32.mrf.mxu0  ;;  %v1814_v49 = vpop.f32.mrf.mxu1 }
 0x4f0   :  { %3258 = vpow2.f32 %v2979_v45  ;;  %v4033_v49 = vld [vmem:[#allocation20_spill] sm:$0xff] }
 0x4f1   :  { %3260 = vpow2.f32 %v2980_v52 }
 0x4f2   :  { %3262 = vtanh.f32 %v1819_v56 }
 0x4fb   :  { %v3257_v57 = vpop.eup %3256 }
 0x4fc   :  { %v1829_v58 = vadd.f32 1.0, %v3257_v57 }
 0x4fd   :  { %v3259_v25 = vpop.eup %3258 }
 0x4fe   :  { %3264 = vrcp.f32 %v1829_v58  ;;  %v1830_v22 = vadd.f32 1.0, %v3259_v25  ;;  %v3261_v24 = vpop.eup %3260  ;;  %v4034_v58 = vld [vmem:[#allocation21_spill] sm:$0xff] }
 0x4ff   :  { %v3263_v27 = vpop.eup %3262  ;;  %v1831_v55 = vadd.f32 1.0, %v3261_v24 }
 0x500   :  { %3266 = vrcp.f32 %v1830_v22 }
 0x501   :  { %3268 = vrcp.f32 %v1831_v55 }
 0x50b   :  { %v3265_v28 = vpop.eup %3264 }
 0x50c   :  { %v1840_v30 = vmul.f32 %v3265_v28, %v3263_v27 }
 0x50d   :  { %v3267_v31 = vpop.eup %3266 }
 0x50e   :  { %v1839_v33 = vmul.f32 %v3267_v31, %v3867_v23  ;;  %v3269_v34 = vpop.eup %3268 }
 0x510   :  { %v3909_v32 = vadd.f32 %v1840_v30, %v1839_v33 }
 0x512   :  { %3270 = vtanh.f32 %v3909_v32 }
 0x51f   :  { %v3271_v35 = vpop.eup %3270 }
 0x520   :  { %v1843_v38 = vmul.f32 %v3271_v35, %v3269_v34 }
 0x522   :  { %v1844_v39 = vpack.c.bf16 %v1843_v38, %v1843_v38 }
 0x524   :  { %1846 = vst [vmem:[#allocation8 + $0x10] sm:$0xf] %v1844_v39  ;;  %2077 = vmatmul.mubr.bf16.vlgmr.msra.gmra.mxu0 %v1844_v39  ;;  %2118 = vmatmul.mubr.bf16.vlgmr.msra.gmra.mxu1 %v1844_v39 }
 0x525   :  { %2355 = vmatpush1.bf16.msra.mxu0 %v3768_v59  ;;  %2396 = vmatpush1.bf16.msra.mxu1 %v3770_v18 }
 0x526   :  { %2356 = vmatprep.subr.bf16.mxu0 %v3776_v36  ;;  %2397 = vmatprep.subr.bf16.mxu1 %v3778_v61 }
 0x527   :  { %2386 = vmatprep.mubr.bf16.mxu0 %v4023_v8  ;;  %2427 = vmatprep.mubr.bf16.mxu1 %v4023_v8 }
 0x529   :  { %2357 = vmatpush1.bf16.msra.mxu0 %v3780_v13  ;;  %2398 = vmatpush1.bf16.msra.mxu1 %v3782_v62 }
 0x52a   :  { %2358 = vmatprep.subr.bf16.mxu0 %v3788_v1  ;;  %2399 = vmatprep.subr.bf16.mxu1 %v3790_v47 }
 0x52d   :  { %2359 = vmatpush1.bf16.msra.mxu0 %v3792_v3  ;;  %2400 = vmatpush1.bf16.msra.mxu1 %v3794_v15 }
 0x52e   :  { %2360 = vmatprep.subr.bf16.mxu0 %v3800_v63  ;;  %2401 = vmatprep.subr.bf16.mxu1 %v3802_v19 }
 0x531   :  { %2361 = vmatpush1.bf16.msra.mxu0 %v3804_v6  ;;  %2402 = vmatpush1.bf16.msra.mxu1 %v3806_v5 }
 0x532   :  { %2362 = vmatprep.subr.bf16.mxu0 %v3810_v11  ;;  %2403 = vmatprep.subr.bf16.mxu1 %v3812_v7 }
 0x535   :  { %2363 = vmatpush1.bf16.msra.mxu0 %v3816_v16  ;;  %2404 = vmatpush1.bf16.msra.mxu1 %v3818_v9 }
 0x536   :  { %2364 = vmatprep.subr.bf16.mxu0 %v3822_v12  ;;  %2405 = vmatprep.subr.bf16.mxu1 %v3824_v53 }
 0x539   :  { %2365 = vmatpush1.bf16.msra.mxu0 %v3828_v17  ;;  %2406 = vmatpush1.bf16.msra.mxu1 %v3830_v14 }
 0x53a   :  { %2366 = vmatprep.subr.bf16.mxu0 %v3834_v10  ;;  %2407 = vmatprep.subr.bf16.mxu1 %v3836_v4 }
 0x53d   :  { %2367 = vmatpush1.bf16.msra.mxu0 %v3840_v26  ;;  %2408 = vmatpush1.bf16.msra.mxu1 %v3842_v2 }
 0x53e   :  { %2368 = vmatprep.subr.bf16.mxu0 %v3846_v29  ;;  %2409 = vmatprep.subr.bf16.mxu1 %v3848_v60 }
 0x541   :  { %2369 = vmatpush1.bf16.msra.mxu0 %v3852_v20  ;;  %2410 = vmatpush1.bf16.msra.mxu1 %v3854_v21 }
 0x542   :  { %2664 = vmatprep.subr.bf16.mxu0 %v3764_v37  ;;  %2705 = vmatprep.subr.bf16.mxu1 %v3766_v40  ;;  %v4035_v40 = vld [vmem:[#allocation23_spill] sm:$0xff] }
 0x5e4   :  { %v2078_v23 = vpop.f32.mrf.mxu0  ;;  %v2119_v41 = vpop.f32.mrf.mxu1 }
 0x5e5   :  { %v2126_v43 = vadd.f32 %v2078_v23, %v4032_v42  ;;  %v2128_v37 = vadd.f32 %v2119_v41, %v4034_v58 }
 0x5e6   :  { %v2080_v44 = vpop.f32.mrf.mxu0  ;;  %v2121_v45 = vpop.f32.mrf.mxu1 }
 0x5e7   :  { %v3013_v46 = vmul.f32 -1.442695, %v2126_v43  ;;  %v2127_v50 = vadd.f32 %v2080_v44, %v4033_v49  ;;  %v3015_v25 = vmul.f32 -1.442695, %v2128_v37  ;;  %v2129_v22 = vadd.f32 %v2121_v45, %v4035_v40 }
 0x5e8   :  { %v2082_v51 = vpop.f32.mrf.mxu0  ;;  %v2123_v52 = vpop.f32.mrf.mxu1 }
 0x5e9   :  { %3272 = vpow2.f32 %v3013_v46  ;;  %v3014_v54 = vmul.f32 -1.442695, %v2127_v50  ;;  %v4040_v52 = vld [vmem:[#allocation26_spill] sm:$0xff] }
 0x5ea   :  { %v2083_v56 = vpop.f32.mrf.mxu0  ;;  %v2124_v57 = vpop.f32.mrf.mxu1 }
 0x5eb   :  { %3274 = vpow2.f32 %v3014_v54 }
 0x5ec   :  { %3276 = vpow2.f32 %v3015_v25 }
 0x5ed   :  { %3278 = vtanh.f32 %v2129_v22 }
 0x5f6   :  { %v3273_v24 = vpop.eup %3272 }
 0x5f7   :  { %v2139_v27 = vadd.f32 1.0, %v3273_v24 }
 0x5f8   :  { %v3275_v28 = vpop.eup %3274 }
 0x5f9   :  { %3280 = vrcp.f32 %v2139_v27  ;;  %v2140_v30 = vadd.f32 1.0, %v3275_v28  ;;  %v3277_v31 = vpop.eup %3276  ;;  %v4041_v28 = vld [vmem:[#allocation28_spill] sm:$0xff] }
 0x5fa   :  { %v3279_v55 = vpop.eup %3278  ;;  %v2141_v38 = vadd.f32 1.0, %v3277_v31 }
 0x5fb   :  { %3282 = vrcp.f32 %v2140_v30 }
 0x5fc   :  { %3284 = vrcp.f32 %v2141_v38 }
 0x606   :  { %v3281_v33 = vpop.eup %3280 }
 0x607   :  { %v2150_v34 = vmul.f32 %v3281_v33, %v3279_v55 }
 0x608   :  { %v3283_v35 = vpop.eup %3282 }
 0x609   :  { %v2149_v39 = vmul.f32 %v3283_v35, %v3909_v32  ;;  %v3285_v41 = vpop.eup %3284 }
 0x60b   :  { %v3951_v23 = vadd.f32 %v2150_v34, %v2149_v39 }
 0x60d   :  { %3286 = vtanh.f32 %v3951_v23 }
 0x61a   :  { %v3287_v42 = vpop.eup %3286 }
 0x61b   :  { %v2153_v43 = vmul.f32 %v3287_v42, %v3285_v41 }
 0x61d   :  { %v2154_v44 = vpack.c.bf16 %v2153_v43, %v2153_v43 }
 0x61f   :  { %2156 = vst [vmem:[#allocation8 + $0x14] sm:$0xf] %v2154_v44  ;;  %2387 = vmatmul.mubr.bf16.vlgmr.msra.gmra.mxu0 %v2154_v44  ;;  %2428 = vmatmul.mubr.bf16.vlgmr.msra.gmra.mxu1 %v2154_v44 }
 0x620   :  { %2665 = vmatpush1.bf16.msra.mxu0 %v3768_v59  ;;  %2706 = vmatpush1.bf16.msra.mxu1 %v3770_v18  ;;  %v4036_v18 = vld [vmem:[#allocation22_spill] sm:$0xff] }
 0x621   :  { %2666 = vmatprep.subr.bf16.mxu0 %v3776_v36  ;;  %2707 = vmatprep.subr.bf16.mxu1 %v3778_v61 }
 0x622   :  { %2696 = vmatprep.mubr.bf16.mxu0 %v4023_v8  ;;  %2737 = vmatprep.mubr.bf16.mxu1 %v4023_v8 }
 0x624   :  { %2667 = vmatpush1.bf16.msra.mxu0 %v3780_v13  ;;  %2708 = vmatpush1.bf16.msra.mxu1 %v3782_v62 }
 0x625   :  { %2668 = vmatprep.subr.bf16.mxu0 %v3788_v1  ;;  %2709 = vmatprep.subr.bf16.mxu1 %v3790_v47  ;;  %v4037_v1 = vld [vmem:[#allocation24_spill] sm:$0xff] }
 0x628   :  { %2669 = vmatpush1.bf16.msra.mxu0 %v3792_v3  ;;  %2710 = vmatpush1.bf16.msra.mxu1 %v3794_v15 }
 0x629   :  { %2670 = vmatprep.subr.bf16.mxu0 %v3800_v63  ;;  %2711 = vmatprep.subr.bf16.mxu1 %v3802_v19 }
 0x62c   :  { %2671 = vmatpush1.bf16.msra.mxu0 %v3804_v6  ;;  %2712 = vmatpush1.bf16.msra.mxu1 %v3806_v5  ;;  %v4038_v5 = vld [vmem:[#allocation25_spill] sm:$0xff] }
 0x62d   :  { %2672 = vmatprep.subr.bf16.mxu0 %v3810_v11  ;;  %2713 = vmatprep.subr.bf16.mxu1 %v3812_v7 }
 0x630   :  { %2673 = vmatpush1.bf16.msra.mxu0 %v3816_v16  ;;  %2714 = vmatpush1.bf16.msra.mxu1 %v3818_v9  ;;  %v4039_v16 = vld [vmem:[#allocation27_spill] sm:$0xff] }
 0x631   :  { %2674 = vmatprep.subr.bf16.mxu0 %v3822_v12  ;;  %2715 = vmatprep.subr.bf16.mxu1 %v3824_v53 }
 0x634   :  { %2675 = vmatpush1.bf16.msra.mxu0 %v3828_v17  ;;  %2716 = vmatpush1.bf16.msra.mxu1 %v3830_v14 }
 0x635   :  { %2676 = vmatprep.subr.bf16.mxu0 %v3834_v10  ;;  %2717 = vmatprep.subr.bf16.mxu1 %v3836_v4 }
 0x638   :  { %2677 = vmatpush1.bf16.msra.mxu0 %v3840_v26  ;;  %2718 = vmatpush1.bf16.msra.mxu1 %v3842_v2 }
 0x639   :  { %2678 = vmatprep.subr.bf16.mxu0 %v3846_v29  ;;  %2719 = vmatprep.subr.bf16.mxu1 %v3848_v60 }
 0x63c   :  { %2679 = vmatpush1.bf16.msra.mxu0 %v3852_v20  ;;  %2720 = vmatpush1.bf16.msra.mxu1 %v3854_v21 }
 0x6df   :  { %v2388_v8 = vpop.f32.mrf.mxu0  ;;  %v2429_v59 = vpop.f32.mrf.mxu1 }
 0x6e0   :  { %v2436_v36 = vadd.f32 %v2388_v8, %v4036_v18  ;;  %v2438_v11 = vadd.f32 %v2429_v59, %v4038_v5 }
 0x6e1   :  { %v2390_v61 = vpop.f32.mrf.mxu0  ;;  %v2431_v13 = vpop.f32.mrf.mxu1 }
 0x6e2   :  { %v3048_v62 = vmul.f32 -1.442695, %v2436_v36  ;;  %v2437_v47 = vadd.f32 %v2390_v61, %v4037_v1  ;;  %v3050_v7 = vmul.f32 -1.442695, %v2438_v11  ;;  %v2439_v9 = vadd.f32 %v2431_v13, %v4039_v16 }
 0x6e3   :  { %v2392_v3 = vpop.f32.mrf.mxu0  ;;  %v2433_v15 = vpop.f32.mrf.mxu1 }
 0x6e4   :  { %3288 = vpow2.f32 %v3048_v62  ;;  %v3049_v63 = vmul.f32 -1.442695, %v2437_v47 }
 0x6e5   :  { %v2393_v19 = vpop.f32.mrf.mxu0  ;;  %v2434_v6 = vpop.f32.mrf.mxu1 }
 0x6e6   :  { %3290 = vpow2.f32 %v3049_v63 }
 0x6e7   :  { %3292 = vpow2.f32 %v3050_v7 }
 0x6e8   :  { %3294 = vtanh.f32 %v2439_v9 }
 0x6f1   :  { %v3289_v12 = vpop.eup %3288 }
 0x6f2   :  { %v2449_v53 = vadd.f32 1.0, %v3289_v12 }
 0x6f3   :  { %v3291_v17 = vpop.eup %3290 }
 0x6f4   :  { %3296 = vrcp.f32 %v2449_v53  ;;  %v2450_v14 = vadd.f32 1.0, %v3291_v17  ;;  %v3293_v10 = vpop.eup %3292 }
 0x6f5   :  { %v3295_v4 = vpop.eup %3294  ;;  %v2451_v60 = vadd.f32 1.0, %v3293_v10 }
 0x6f6   :  { %3298 = vrcp.f32 %v2450_v14 }
 0x6f7   :  { %3300 = vrcp.f32 %v2451_v60 }
 0x701   :  { %v3297_v26 = vpop.eup %3296 }
 0x702   :  { %v2460_v2 = vmul.f32 %v3297_v26, %v3295_v4 }
 0x703   :  { %v3299_v29 = vpop.eup %3298 }
 0x704   :  { %v2459_v20 = vmul.f32 %v3299_v29, %v3951_v23  ;;  %v3301_v32 = vpop.eup %3300 }
 0x706   :  { %v2461_v21 = vadd.f32 %v2460_v2, %v2459_v20 }
 0x708   :  { %3302 = vtanh.f32 %v2461_v21 }
 0x715   :  { %v3303_v45 = vpop.eup %3302 }
 0x716   :  { %v2463_v46 = vmul.f32 %v3303_v45, %v3301_v32 }
 0x718   :  { %v2464_v49 = vpack.c.bf16 %v2463_v46, %v2463_v46 }
 0x71a   :  { %2466 = vst [vmem:[#allocation8 + $0x18] sm:$0xf] %v2464_v49  ;;  %2697 = vmatmul.mubr.bf16.vlgmr.msra.gmra.mxu0 %v2464_v49  ;;  %2738 = vmatmul.mubr.bf16.vlgmr.msra.gmra.mxu1 %v2464_v49 }
 0x7da   :  { %v2698_v50 = vpop.f32.mrf.mxu0  ;;  %v2739_v51 = vpop.f32.mrf.mxu1 }
 0x7db   :  { %v2746_v54 = vadd.f32 %v2698_v50, %v4040_v52  ;;  %v2748_v30 = vadd.f32 %v2739_v51, %v4041_v28 }
 0x7dc   :  { %v2700_v56 = vpop.f32.mrf.mxu0  ;;  %v2741_v57 = vpop.f32.mrf.mxu1 }
 0x7dd   :  { %v3083_v58 = vmul.f32 -1.442695, %v2746_v54  ;;  %v2747_v37 = vadd.f32 %v2700_v56, %v3664_v0  ;;  %v3085_v31 = vmul.f32 -1.442695, %v2748_v30  ;;  %v2749_v55 = vadd.f32 %v2741_v57, %v3671_v48 }
 0x7de   :  { %v2702_v25 = vpop.f32.mrf.mxu0  ;;  %v2743_v40 = vpop.f32.mrf.mxu1 }
 0x7df   :  { %3304 = vpow2.f32 %v3083_v58  ;;  %v3084_v22 = vmul.f32 -1.442695, %v2747_v37 }
 0x7e0   :  { %v2703_v24 = vpop.f32.mrf.mxu0  ;;  %v2744_v27 = vpop.f32.mrf.mxu1 }
 0x7e1   :  { %3306 = vpow2.f32 %v3084_v22 }
 0x7e2   :  { %3308 = vpow2.f32 %v3085_v31 }
 0x7e3   :  { %3310 = vtanh.f32 %v2749_v55 }
 0x7ec   :  { %v3305_v33 = vpop.eup %3304 }
 0x7ed   :  { %v2759_v34 = vadd.f32 1.0, %v3305_v33 }
 0x7ee   :  { %v3307_v35 = vpop.eup %3306 }
 0x7ef   :  { %3312 = vrcp.f32 %v2759_v34  ;;  %v2760_v38 = vadd.f32 1.0, %v3307_v35  ;;  %v3309_v0 = vpop.eup %3308 }
 0x7f0   :  { %v3311_v39 = vpop.eup %3310  ;;  %v2761_v43 = vadd.f32 1.0, %v3309_v0 }
 0x7f1   :  { %3314 = vrcp.f32 %v2760_v38 }
 0x7f2   :  { %3316 = vrcp.f32 %v2761_v43 }
 0x7fc   :  { %v3313_v23 = vpop.eup %3312 }
 0x7fd   :  { %v2770_v41 = vmul.f32 %v3313_v23, %v3311_v39 }
 0x7fe   :  { %v3315_v42 = vpop.eup %3314 }
 0x7ff   :  { %v2769_v44 = vmul.f32 %v3315_v42, %v2461_v21  ;;  %v3317_v59 = vpop.eup %3316 }
 0x801   :  { %v2771_v8 = vadd.f32 %v2770_v41, %v2769_v44 }
 0x803   :  { %3318 = vtanh.f32 %v2771_v8 }
 0x810   :  { %v3319_v48 = vpop.eup %3318 }
 0x811   :  { %v2773_v18 = vmul.f32 %v3319_v48, %v3317_v59 }
 0x813   :  { %v2774_v36 = vpack.c.bf16 %v2773_v18, %v2773_v18 }
 0x815   :  { %2776 = vst [vmem:[#allocation8 + $0x1c] sm:$0xf] %v2774_v36 }
 0x816   :  { %3351 = shalt.err (!%p3348_p9)
}
 0x817   :  { %s3371_s15 = smov 64   ;;  %s3372_s16 = smov 4  }
 0x818   :  { %2790 = dma.vmem_to_hbm [thread:$0]  %s2785_s13, 512, %s4002_s4, [#allocation7], %s3371_s15, %s3371_s15, %s3372_s16  }
 0x819   :  { %3362 = dma.done.wait [#allocation7], 512  }
 0x81a   :  { %3363 = vsyncadd [#allocation7], 4294966784 }
 0x81b   :  { %2794 = vsyncpa [#allocation6], 1 }
 0x81c   :  { %2795 = vsyncpa [#allocation7], 1 }

</bundles_post_ra>
